<compile_context>
chip_gen: v7x
topology: tpu7x:2x2x1
jax: 0.10.0
libtpu: 0.0.40
codegen_flags: <defaults>
</compile_context>

<pallas_src>
import jax
import jax.numpy as jnp
from jax.experimental import pallas as pl
from jax.experimental.pallas import tpu as pltpu


def _cdiv(a, b):
    return -(-a // b)


def _make_linear_attention_kernel(C, heads, dim_head, N, b_blk):
    hidden = heads * dim_head
    scale = float(dim_head) ** -0.5
    inv_n = 1.0 / float(N)
    eps = 1e-5  # LayerNorm eps for float32 inputs (matches the PyTorch module)

    def kernel(x_ref, wqkv_ref, wout_ref, bout_ref, g_ref, o_ref):
        # Weights: constant index_map -> DMA'd once per pallas_call.
        w_qkv = wqkv_ref[...]          # (3*hidden, C)
        w_out = wout_ref[...]          # (C, hidden)
        b_out = bout_ref[...]          # (C, 1)
        g = g_ref[...]                 # (C, 1)

        # Static unroll over the samples of this batch block (b_blk is small).
        for bi in range(b_blk):
            x = x_ref[bi]                                            # (C, N)

            # to_qkv: 1x1 conv, no bias == one matmul over channels.
            qkv = jnp.dot(w_qkv, x,
                          preferred_element_type=jnp.float32)        # (3*hidden, N)

            y = jnp.zeros((C, N), jnp.float32)
            for h in range(heads):
                d0 = h * dim_head
                q_h = qkv[d0:d0 + dim_head, :]                               # (d, N)
                k_h = qkv[hidden + d0:hidden + d0 + dim_head, :]             # (d, N)
                v_h = qkv[2 * hidden + d0:2 * hidden + d0 + dim_head, :]     # (d, N)

                # q softmax over d (sublanes); denominator applied later to the
                # small (C, N) partial instead of the (d, N) tensor.
                q_e = jnp.exp(q_h - jnp.max(q_h, axis=0, keepdims=True))     # (d, N)
                inv_qsum = pl.reciprocal(
                    jnp.sum(q_e, axis=0, keepdims=True), approx=True)        # (1, N)

                # k softmax over n (lanes); normalization folded into the
                # (d, e) context rows instead of the (d, N) tensor.
                k_e = jnp.exp(k_h - jnp.max(k_h, axis=1, keepdims=True))     # (d, N)
                inv_ksum = pl.reciprocal(
                    jnp.sum(k_e, axis=1, keepdims=True), approx=True)        # (d, 1)

                # ctx[d, e] = sum_n k_e[d, n] * v[e, n]  (rhs-transposed dot)
                ctx = jax.lax.dot_general(
                    k_e, v_h, (((1,), (1,)), ((), ())),
                    preferred_element_type=jnp.float32)                       # (d, e)
                # fold softmax-k norm, dim_head**-0.5 and 1/(h*w) into (d, e)
                ctx = ctx * ((scale * inv_n) * inv_ksum)

                # Fold to_out into the head loop:
                #   M[c, d] = sum_e wout[c, hd0+e] * ctx[d, e]
                w_h = w_out[:, d0:d0 + dim_head]                              # (C, d)
                m = jax.lax.dot_general(
                    w_h, ctx, (((1,), (1,)), ((), ())),
                    preferred_element_type=jnp.float32)                       # (C, d)
                # y += (M @ q_e) * 1/qsum  -> per-head (C, N) partial
                y = y + jnp.dot(m, q_e,
                                preferred_element_type=jnp.float32) * inv_qsum

            # to_out bias, then channel-wise LayerNorm (unbiased=False, eps 1e-5)
            y = y + b_out
            mean = jnp.mean(y, axis=0, keepdims=True)
            var = jnp.mean((y - mean) ** 2, axis=0, keepdims=True)
            o_ref[bi] = (y - mean) * jax.lax.rsqrt(var + eps) * g

    return kernel


def linear_attention_forward(x_nchw, params, *, heads, dim_head):
    B, C, H, W = x_nchw.shape
    N = H * W

    # Channel-major, spatial folded onto the lane axis: pure reshape from NCHW.
    x = x_nchw.reshape(B, C, N).astype(jnp.float32)

    # Batch blocking: keep >= 2 grid steps when B >= 2 (v7x megacore), cap the
    # in-kernel unroll so huge batches don't explode code size.
    n_steps_target = 2 if B >= 2 else 1
    b_blk = min(_cdiv(B, n_steps_target), 8)
    n_steps = _cdiv(B, b_blk)
    b_pad = n_steps * b_blk
    if b_pad != B:
        x = jnp.pad(x, ((0, b_pad - B), (0, 0), (0, 0)))

    kernel = _make_linear_attention_kernel(C, heads, dim_head, N, b_blk)

    grid_spec = pltpu.PrefetchScalarGridSpec(
        num_scalar_prefetch=0,
        grid=(n_steps,),
        in_specs=[
            pl.BlockSpec((b_blk, C, N), lambda s: (s, 0, 0)),      # x block
            pl.BlockSpec(params["wqkv"].shape, lambda s: (0, 0)),  # (3*hidden, C)
            pl.BlockSpec(params["wout"].shape, lambda s: (0, 0)),  # (C, hidden)
            pl.BlockSpec(params["bout"].shape, lambda s: (0, 0)),  # (C, 1)
            pl.BlockSpec(params["g"].shape, lambda s: (0, 0)),     # (C, 1)
        ],
        out_specs=pl.BlockSpec((b_blk, C, N), lambda s: (s, 0, 0)),
    )

    out = pl.pallas_call(
        kernel,
        out_shape=jax.ShapeDtypeStruct((b_pad, C, N), jnp.float32),
        grid_spec=grid_spec,
        compiler_params=pltpu.CompilerParams(
            # batch is embarrassingly parallel -> v7x can use both TensorCores.
            dimension_semantics=("parallel",)),
    )(x, params["wqkv"], params["wout"], params["bout"], params["g"])

    return out[:B].reshape(B, C, H, W)


def init_params(key, dim, heads, dim_head):
    hidden = heads * dim_head
    ks = jax.random.split(key, 4)

    def n(k, shape, s):
        return s * jax.random.normal(k, shape, dtype=jnp.float32)

    return dict(
        wqkv=n(ks[0], (3 * hidden, dim), 1.0),   # Conv2d(dim, 3*hidden, 1, bias=False)
        wout=n(ks[1], (dim, hidden), 1.0),       # Conv2d(hidden, dim, 1).weight
        bout=n(ks[2], (dim, 1), 0.5),            # Conv2d(hidden, dim, 1).bias
        g=1.0 + n(ks[3], (dim, 1), 0.05),        # LayerNorm.g (1, dim, 1, 1)
    )


def linear_attention_reference(x_nchw, params, heads, dim_head):
    # Pure-JAX reference mirroring the PyTorch forward (correctness check).
    B, C, H, W = x_nchw.shape
    N = H * W
    hidden = heads * dim_head
    scale = float(dim_head) ** -0.5
    hp = jax.lax.Precision.HIGHEST

    xf = x_nchw.reshape(B, C, N)
    qkv = jnp.einsum("oc,bcn->bon", params["wqkv"], xf, precision=hp)
    q = qkv[:, :hidden].reshape(B, heads, dim_head, N)
    k = qkv[:, hidden:2 * hidden].reshape(B, heads, dim_head, N)
    v = qkv[:, 2 * hidden:].reshape(B, heads, dim_head, N)

    q = jax.nn.softmax(q, axis=-2) * scale
    k = jax.nn.softmax(k, axis=-1)
    v = v / N

    context = jnp.einsum("bhdn,bhen->bhde", k, v, precision=hp)
    out = jnp.einsum("bhde,bhdn->bhen", context, q, precision=hp)
    out = out.reshape(B, hidden, N)

    y = jnp.einsum("ch,bhn->bcn", params["wout"], out, precision=hp)
    y = y + params["bout"][None]
    mean = jnp.mean(y, axis=1, keepdims=True)
    var = jnp.mean((y - mean) ** 2, axis=1, keepdims=True)
    y = (y - mean) * jax.lax.rsqrt(var + 1e-5) * params["g"][None]
    return y.reshape(B, C, H, W)


if __name__ == "__main__":
    B, dim = 2, 4
    H = W = 16
    heads, dim_head = 4, 32          # hidden_dim = 128, N = 256

    key = jax.random.PRNGKey(0)
    kx, kp = jax.random.split(key, 2)
    x = jax.random.normal(kx, (B, dim, H, W), dtype=jnp.float32)   # NCHW input
    params = init_params(kp, dim, heads, dim_head)

    out = linear_attention_forward(x, params, heads=heads, dim_head=dim_head)
    out = jax.block_until_ready(out)

    ref = linear_attention_reference(x, params, heads, dim_head)
    assert out.shape == (B, dim, H, W)
    err = float(jnp.max(jnp.abs(out - ref)))
    assert jnp.allclose(out, ref, atol=2e-3, rtol=2e-3), err
    print("KERNEL_OK")
</pallas_src>

<mosaic_0001>
module attributes {stable_mosaic.version = 11 : i64} {
  func.func @kernel(%arg0: i32, %arg1: memref<1x4x256xf32, #tpu.memory_space<vmem>>, %arg2: memref<384x4xf32, #tpu.memory_space<vmem>>, %arg3: memref<4x128xf32, #tpu.memory_space<vmem>>, %arg4: memref<4x1xf32, #tpu.memory_space<vmem>>, %arg5: memref<4x1xf32, #tpu.memory_space<vmem>>, %arg6: memref<1x4x256xf32, #tpu.memory_space<vmem>>) attributes {dimension_semantics = [#tpu.dimension_semantics<parallel>], iteration_bounds = array<i64: 2>, scalar_prefetch = 0 : i64, scratch_operands = 0 : i64, tpu.core_type = #tpu.core_type<tc>, window_params = [{transform_indices = @transform_0, window_bounds = array<i64: 1, 4, 256>}, {pipeline_mode = #tpu.pipeline_mode<synchronous>, transform_indices = @transform_1, window_bounds = array<i64: 384, 4>}, {pipeline_mode = #tpu.pipeline_mode<synchronous>, transform_indices = @transform_2, window_bounds = array<i64: 4, 128>}, {pipeline_mode = #tpu.pipeline_mode<synchronous>, transform_indices = @transform_3, window_bounds = array<i64: 4, 1>}, {pipeline_mode = #tpu.pipeline_mode<synchronous>, transform_indices = @transform_4, window_bounds = array<i64: 4, 1>}, {transform_indices = @transform_5, window_bounds = array<i64: 1, 4, 256>}]} {
    %c0 = arith.constant 0 : index
    %c0_0 = arith.constant 0 : index
    %0 = vector.load %arg2[%c0, %c0_0] : memref<384x4xf32, #tpu.memory_space<vmem>>, vector<384x4xf32>
    %c0_1 = arith.constant 0 : index
    %c0_2 = arith.constant 0 : index
    %1 = vector.load %arg3[%c0_1, %c0_2] : memref<4x128xf32, #tpu.memory_space<vmem>>, vector<4x128xf32>
    %c0_3 = arith.constant 0 : index
    %c0_4 = arith.constant 0 : index
    %2 = vector.load %arg4[%c0_3, %c0_4] : memref<4x1xf32, #tpu.memory_space<vmem>>, vector<4x1xf32>
    %c0_5 = arith.constant 0 : index
    %c0_6 = arith.constant 0 : index
    %3 = vector.load %arg5[%c0_5, %c0_6] : memref<4x1xf32, #tpu.memory_space<vmem>>, vector<4x1xf32>
    %c0_7 = arith.constant 0 : index
    %c0_8 = arith.constant 0 : index
    %c0_9 = arith.constant 0 : index
    %4 = vector.load %arg1[%c0_7, %c0_8, %c0_9] : memref<1x4x256xf32, #tpu.memory_space<vmem>>, vector<1x4x256xf32>
    %5 = vector.shape_cast %4 : vector<1x4x256xf32> to vector<4x256xf32>
    %cst = arith.constant dense<0.000000e+00> : vector<384x256xf32>
    %6 = tpu.matmul %0, %5, %cst {dimension_numbers = #tpu.dot_dimension_numbers<[1], [0], [0], [1], [0, 0, 1, 1], [], []>} : vector<384x4xf32>, vector<4x256xf32>, vector<384x256xf32> -> vector<384x256xf32>
    %cst_10 = arith.constant 0.000000e+00 : f32
    %7 = vector.broadcast %cst_10 : f32 to vector<4x256xf32>
    %8 = vector.extract_strided_slice %6 {offsets = [0, 0], sizes = [32, 256], strides = [1, 1]} : vector<384x256xf32> to vector<32x256xf32>
    %9 = vector.extract_strided_slice %6 {offsets = [128, 0], sizes = [32, 256], strides = [1, 1]} : vector<384x256xf32> to vector<32x256xf32>
    %10 = vector.extract_strided_slice %6 {offsets = [256, 0], sizes = [32, 256], strides = [1, 1]} : vector<384x256xf32> to vector<32x256xf32>
    %cst_11 = arith.constant dense<0xFF800000> : vector<256xf32>
    %11 = vector.multi_reduction <maximumf>, %8, %cst_11 [0] : vector<32x256xf32> to vector<256xf32>
    %12 = vector.shape_cast %11 : vector<256xf32> to vector<1x256xf32>
    %13 = vector.broadcast %12 : vector<1x256xf32> to vector<32x256xf32>
    %14 = arith.subf %8, %13 : vector<32x256xf32>
    %15 = math.exp %14 : vector<32x256xf32>
    %cst_12 = arith.constant dense<0.000000e+00> : vector<256xf32>
    %16 = vector.multi_reduction <add>, %15, %cst_12 [0] : vector<32x256xf32> to vector<256xf32>
    %17 = vector.shape_cast %16 : vector<256xf32> to vector<1x256xf32>
    %18 = tpu.reciprocal %17 {approx = true} : vector<1x256xf32> -> vector<1x256xf32>
    %cst_13 = arith.constant dense<0xFF800000> : vector<32xf32>
    %19 = vector.multi_reduction <maximumf>, %9, %cst_13 [1] : vector<32x256xf32> to vector<32xf32>
    %20 = vector.shape_cast %19 : vector<32xf32> to vector<32x1xf32>
    %21 = vector.broadcast %20 : vector<32x1xf32> to vector<32x256xf32>
    %22 = arith.subf %9, %21 : vector<32x256xf32>
    %23 = math.exp %22 : vector<32x256xf32>
    %cst_14 = arith.constant dense<0.000000e+00> : vector<32xf32>
    %24 = vector.multi_reduction <add>, %23, %cst_14 [1] : vector<32x256xf32> to vector<32xf32>
    %25 = vector.shape_cast %24 : vector<32xf32> to vector<32x1xf32>
    %26 = tpu.reciprocal %25 {approx = true} : vector<32x1xf32> -> vector<32x1xf32>
    %cst_15 = arith.constant dense<0.000000e+00> : vector<32x32xf32>
    %27 = tpu.matmul %23, %10, %cst_15 {dimension_numbers = #tpu.dot_dimension_numbers<[1], [1], [0], [0], [0, 0, 1, 0], [], []>} : vector<32x256xf32>, vector<32x256xf32>, vector<32x32xf32> -> vector<32x32xf32>
    %cst_16 = arith.constant 6.90533954E-4 : f32
    %28 = vector.broadcast %cst_16 : f32 to vector<32x1xf32>
    %29 = arith.mulf %28, %26 : vector<32x1xf32>
    %30 = vector.broadcast %29 : vector<32x1xf32> to vector<32x32xf32>
    %31 = arith.mulf %27, %30 : vector<32x32xf32>
    %32 = vector.extract_strided_slice %1 {offsets = [0, 0], sizes = [4, 32], strides = [1, 1]} : vector<4x128xf32> to vector<4x32xf32>
    %cst_17 = arith.constant dense<0.000000e+00> : vector<4x32xf32>
    %33 = tpu.matmul %32, %31, %cst_17 {dimension_numbers = #tpu.dot_dimension_numbers<[1], [1], [0], [0], [0, 0, 1, 0], [], []>} : vector<4x32xf32>, vector<32x32xf32>, vector<4x32xf32> -> vector<4x32xf32>
    %cst_18 = arith.constant dense<0.000000e+00> : vector<4x256xf32>
    %34 = tpu.matmul %33, %15, %cst_18 {dimension_numbers = #tpu.dot_dimension_numbers<[1], [0], [0], [1], [0, 0, 1, 1], [], []>} : vector<4x32xf32>, vector<32x256xf32>, vector<4x256xf32> -> vector<4x256xf32>
    %35 = vector.broadcast %18 : vector<1x256xf32> to vector<4x256xf32>
    %36 = arith.mulf %34, %35 : vector<4x256xf32>
    %37 = arith.addf %7, %36 : vector<4x256xf32>
    %38 = vector.extract_strided_slice %6 {offsets = [32, 0], sizes = [32, 256], strides = [1, 1]} : vector<384x256xf32> to vector<32x256xf32>
    %39 = vector.extract_strided_slice %6 {offsets = [160, 0], sizes = [32, 256], strides = [1, 1]} : vector<384x256xf32> to vector<32x256xf32>
    %40 = vector.extract_strided_slice %6 {offsets = [288, 0], sizes = [32, 256], strides = [1, 1]} : vector<384x256xf32> to vector<32x256xf32>
    %cst_19 = arith.constant dense<0xFF800000> : vector<256xf32>
    %41 = vector.multi_reduction <maximumf>, %38, %cst_19 [0] : vector<32x256xf32> to vector<256xf32>
    %42 = vector.shape_cast %41 : vector<256xf32> to vector<1x256xf32>
    %43 = vector.broadcast %42 : vector<1x256xf32> to vector<32x256xf32>
    %44 = arith.subf %38, %43 : vector<32x256xf32>
    %45 = math.exp %44 : vector<32x256xf32>
    %cst_20 = arith.constant dense<0.000000e+00> : vector<256xf32>
    %46 = vector.multi_reduction <add>, %45, %cst_20 [0] : vector<32x256xf32> to vector<256xf32>
    %47 = vector.shape_cast %46 : vector<256xf32> to vector<1x256xf32>
    %48 = tpu.reciprocal %47 {approx = true} : vector<1x256xf32> -> vector<1x256xf32>
    %cst_21 = arith.constant dense<0xFF800000> : vector<32xf32>
    %49 = vector.multi_reduction <maximumf>, %39, %cst_21 [1] : vector<32x256xf32> to vector<32xf32>
    %50 = vector.shape_cast %49 : vector<32xf32> to vector<32x1xf32>
    %51 = vector.broadcast %50 : vector<32x1xf32> to vector<32x256xf32>
    %52 = arith.subf %39, %51 : vector<32x256xf32>
    %53 = math.exp %52 : vector<32x256xf32>
    %cst_22 = arith.constant dense<0.000000e+00> : vector<32xf32>
    %54 = vector.multi_reduction <add>, %53, %cst_22 [1] : vector<32x256xf32> to vector<32xf32>
    %55 = vector.shape_cast %54 : vector<32xf32> to vector<32x1xf32>
    %56 = tpu.reciprocal %55 {approx = true} : vector<32x1xf32> -> vector<32x1xf32>
    %cst_23 = arith.constant dense<0.000000e+00> : vector<32x32xf32>
    %57 = tpu.matmul %53, %40, %cst_23 {dimension_numbers = #tpu.dot_dimension_numbers<[1], [1], [0], [0], [0, 0, 1, 0], [], []>} : vector<32x256xf32>, vector<32x256xf32>, vector<32x32xf32> -> vector<32x32xf32>
    %cst_24 = arith.constant 6.90533954E-4 : f32
    %58 = vector.broadcast %cst_24 : f32 to vector<32x1xf32>
    %59 = arith.mulf %58, %56 : vector<32x1xf32>
    %60 = vector.broadcast %59 : vector<32x1xf32> to vector<32x32xf32>
    %61 = arith.mulf %57, %60 : vector<32x32xf32>
    %62 = vector.extract_strided_slice %1 {offsets = [0, 32], sizes = [4, 32], strides = [1, 1]} : vector<4x128xf32> to vector<4x32xf32>
    %cst_25 = arith.constant dense<0.000000e+00> : vector<4x32xf32>
    %63 = tpu.matmul %62, %61, %cst_25 {dimension_numbers = #tpu.dot_dimension_numbers<[1], [1], [0], [0], [0, 0, 1, 0], [], []>} : vector<4x32xf32>, vector<32x32xf32>, vector<4x32xf32> -> vector<4x32xf32>
    %cst_26 = arith.constant dense<0.000000e+00> : vector<4x256xf32>
    %64 = tpu.matmul %63, %45, %cst_26 {dimension_numbers = #tpu.dot_dimension_numbers<[1], [0], [0], [1], [0, 0, 1, 1], [], []>} : vector<4x32xf32>, vector<32x256xf32>, vector<4x256xf32> -> vector<4x256xf32>
    %65 = vector.broadcast %48 : vector<1x256xf32> to vector<4x256xf32>
    %66 = arith.mulf %64, %65 : vector<4x256xf32>
    %67 = arith.addf %37, %66 : vector<4x256xf32>
    %68 = vector.extract_strided_slice %6 {offsets = [64, 0], sizes = [32, 256], strides = [1, 1]} : vector<384x256xf32> to vector<32x256xf32>
    %69 = vector.extract_strided_slice %6 {offsets = [192, 0], sizes = [32, 256], strides = [1, 1]} : vector<384x256xf32> to vector<32x256xf32>
    %70 = vector.extract_strided_slice %6 {offsets = [320, 0], sizes = [32, 256], strides = [1, 1]} : vector<384x256xf32> to vector<32x256xf32>
    %cst_27 = arith.constant dense<0xFF800000> : vector<256xf32>
    %71 = vector.multi_reduction <maximumf>, %68, %cst_27 [0] : vector<32x256xf32> to vector<256xf32>
    %72 = vector.shape_cast %71 : vector<256xf32> to vector<1x256xf32>
    %73 = vector.broadcast %72 : vector<1x256xf32> to vector<32x256xf32>
    %74 = arith.subf %68, %73 : vector<32x256xf32>
    %75 = math.exp %74 : vector<32x256xf32>
    %cst_28 = arith.constant dense<0.000000e+00> : vector<256xf32>
    %76 = vector.multi_reduction <add>, %75, %cst_28 [0] : vector<32x256xf32> to vector<256xf32>
    %77 = vector.shape_cast %76 : vector<256xf32> to vector<1x256xf32>
    %78 = tpu.reciprocal %77 {approx = true} : vector<1x256xf32> -> vector<1x256xf32>
    %cst_29 = arith.constant dense<0xFF800000> : vector<32xf32>
    %79 = vector.multi_reduction <maximumf>, %69, %cst_29 [1] : vector<32x256xf32> to vector<32xf32>
    %80 = vector.shape_cast %79 : vector<32xf32> to vector<32x1xf32>
    %81 = vector.broadcast %80 : vector<32x1xf32> to vector<32x256xf32>
    %82 = arith.subf %69, %81 : vector<32x256xf32>
    %83 = math.exp %82 : vector<32x256xf32>
    %cst_30 = arith.constant dense<0.000000e+00> : vector<32xf32>
    %84 = vector.multi_reduction <add>, %83, %cst_30 [1] : vector<32x256xf32> to vector<32xf32>
    %85 = vector.shape_cast %84 : vector<32xf32> to vector<32x1xf32>
    %86 = tpu.reciprocal %85 {approx = true} : vector<32x1xf32> -> vector<32x1xf32>
    %cst_31 = arith.constant dense<0.000000e+00> : vector<32x32xf32>
    %87 = tpu.matmul %83, %70, %cst_31 {dimension_numbers = #tpu.dot_dimension_numbers<[1], [1], [0], [0], [0, 0, 1, 0], [], []>} : vector<32x256xf32>, vector<32x256xf32>, vector<32x32xf32> -> vector<32x32xf32>
    %cst_32 = arith.constant 6.90533954E-4 : f32
    %88 = vector.broadcast %cst_32 : f32 to vector<32x1xf32>
    %89 = arith.mulf %88, %86 : vector<32x1xf32>
    %90 = vector.broadcast %89 : vector<32x1xf32> to vector<32x32xf32>
    %91 = arith.mulf %87, %90 : vector<32x32xf32>
    %92 = vector.extract_strided_slice %1 {offsets = [0, 64], sizes = [4, 32], strides = [1, 1]} : vector<4x128xf32> to vector<4x32xf32>
    %cst_33 = arith.constant dense<0.000000e+00> : vector<4x32xf32>
    %93 = tpu.matmul %92, %91, %cst_33 {dimension_numbers = #tpu.dot_dimension_numbers<[1], [1], [0], [0], [0, 0, 1, 0], [], []>} : vector<4x32xf32>, vector<32x32xf32>, vector<4x32xf32> -> vector<4x32xf32>
    %cst_34 = arith.constant dense<0.000000e+00> : vector<4x256xf32>
    %94 = tpu.matmul %93, %75, %cst_34 {dimension_numbers = #tpu.dot_dimension_numbers<[1], [0], [0], [1], [0, 0, 1, 1], [], []>} : vector<4x32xf32>, vector<32x256xf32>, vector<4x256xf32> -> vector<4x256xf32>
    %95 = vector.broadcast %78 : vector<1x256xf32> to vector<4x256xf32>
    %96 = arith.mulf %94, %95 : vector<4x256xf32>
    %97 = arith.addf %67, %96 : vector<4x256xf32>
    %98 = vector.extract_strided_slice %6 {offsets = [96, 0], sizes = [32, 256], strides = [1, 1]} : vector<384x256xf32> to vector<32x256xf32>
    %99 = vector.extract_strided_slice %6 {offsets = [224, 0], sizes = [32, 256], strides = [1, 1]} : vector<384x256xf32> to vector<32x256xf32>
    %100 = vector.extract_strided_slice %6 {offsets = [352, 0], sizes = [32, 256], strides = [1, 1]} : vector<384x256xf32> to vector<32x256xf32>
    %cst_35 = arith.constant dense<0xFF800000> : vector<256xf32>
    %101 = vector.multi_reduction <maximumf>, %98, %cst_35 [0] : vector<32x256xf32> to vector<256xf32>
    %102 = vector.shape_cast %101 : vector<256xf32> to vector<1x256xf32>
    %103 = vector.broadcast %102 : vector<1x256xf32> to vector<32x256xf32>
    %104 = arith.subf %98, %103 : vector<32x256xf32>
    %105 = math.exp %104 : vector<32x256xf32>
    %cst_36 = arith.constant dense<0.000000e+00> : vector<256xf32>
    %106 = vector.multi_reduction <add>, %105, %cst_36 [0] : vector<32x256xf32> to vector<256xf32>
    %107 = vector.shape_cast %106 : vector<256xf32> to vector<1x256xf32>
    %108 = tpu.reciprocal %107 {approx = true} : vector<1x256xf32> -> vector<1x256xf32>
    %cst_37 = arith.constant dense<0xFF800000> : vector<32xf32>
    %109 = vector.multi_reduction <maximumf>, %99, %cst_37 [1] : vector<32x256xf32> to vector<32xf32>
    %110 = vector.shape_cast %109 : vector<32xf32> to vector<32x1xf32>
    %111 = vector.broadcast %110 : vector<32x1xf32> to vector<32x256xf32>
    %112 = arith.subf %99, %111 : vector<32x256xf32>
    %113 = math.exp %112 : vector<32x256xf32>
    %cst_38 = arith.constant dense<0.000000e+00> : vector<32xf32>
    %114 = vector.multi_reduction <add>, %113, %cst_38 [1] : vector<32x256xf32> to vector<32xf32>
    %115 = vector.shape_cast %114 : vector<32xf32> to vector<32x1xf32>
    %116 = tpu.reciprocal %115 {approx = true} : vector<32x1xf32> -> vector<32x1xf32>
    %cst_39 = arith.constant dense<0.000000e+00> : vector<32x32xf32>
    %117 = tpu.matmul %113, %100, %cst_39 {dimension_numbers = #tpu.dot_dimension_numbers<[1], [1], [0], [0], [0, 0, 1, 0], [], []>} : vector<32x256xf32>, vector<32x256xf32>, vector<32x32xf32> -> vector<32x32xf32>
    %cst_40 = arith.constant 6.90533954E-4 : f32
    %118 = vector.broadcast %cst_40 : f32 to vector<32x1xf32>
    %119 = arith.mulf %118, %116 : vector<32x1xf32>
    %120 = vector.broadcast %119 : vector<32x1xf32> to vector<32x32xf32>
    %121 = arith.mulf %117, %120 : vector<32x32xf32>
    %122 = vector.extract_strided_slice %1 {offsets = [0, 96], sizes = [4, 32], strides = [1, 1]} : vector<4x128xf32> to vector<4x32xf32>
    %cst_41 = arith.constant dense<0.000000e+00> : vector<4x32xf32>
    %123 = tpu.matmul %122, %121, %cst_41 {dimension_numbers = #tpu.dot_dimension_numbers<[1], [1], [0], [0], [0, 0, 1, 0], [], []>} : vector<4x32xf32>, vector<32x32xf32>, vector<4x32xf32> -> vector<4x32xf32>
    %cst_42 = arith.constant dense<0.000000e+00> : vector<4x256xf32>
    %124 = tpu.matmul %123, %105, %cst_42 {dimension_numbers = #tpu.dot_dimension_numbers<[1], [0], [0], [1], [0, 0, 1, 1], [], []>} : vector<4x32xf32>, vector<32x256xf32>, vector<4x256xf32> -> vector<4x256xf32>
    %125 = vector.broadcast %108 : vector<1x256xf32> to vector<4x256xf32>
    %126 = arith.mulf %124, %125 : vector<4x256xf32>
    %127 = arith.addf %97, %126 : vector<4x256xf32>
    %128 = vector.broadcast %2 : vector<4x1xf32> to vector<4x256xf32>
    %129 = arith.addf %127, %128 : vector<4x256xf32>
    %cst_43 = arith.constant dense<0.000000e+00> : vector<256xf32>
    %130 = vector.multi_reduction <add>, %129, %cst_43 [0] : vector<4x256xf32> to vector<256xf32>
    %131 = vector.shape_cast %130 : vector<256xf32> to vector<1x256xf32>
    %cst_44 = arith.constant 4.000000e+00 : f32
    %132 = vector.broadcast %cst_44 : f32 to vector<1x256xf32>
    %133 = arith.divf %131, %132 : vector<1x256xf32>
    %134 = vector.broadcast %133 : vector<1x256xf32> to vector<4x256xf32>
    %135 = arith.subf %129, %134 : vector<4x256xf32>
    %136 = arith.mulf %135, %135 : vector<4x256xf32>
    %cst_45 = arith.constant dense<0.000000e+00> : vector<256xf32>
    %137 = vector.multi_reduction <add>, %136, %cst_45 [0] : vector<4x256xf32> to vector<256xf32>
    %138 = vector.shape_cast %137 : vector<256xf32> to vector<1x256xf32>
    %cst_46 = arith.constant 4.000000e+00 : f32
    %139 = vector.broadcast %cst_46 : f32 to vector<1x256xf32>
    %140 = arith.divf %138, %139 : vector<1x256xf32>
    %141 = vector.broadcast %133 : vector<1x256xf32> to vector<4x256xf32>
    %142 = arith.subf %129, %141 : vector<4x256xf32>
    %cst_47 = arith.constant 9.99999974E-6 : f32
    %143 = vector.broadcast %cst_47 : f32 to vector<1x256xf32>
    %144 = arith.addf %140, %143 : vector<1x256xf32>
    %145 = math.rsqrt %144 : vector<1x256xf32>
    %146 = vector.broadcast %145 : vector<1x256xf32> to vector<4x256xf32>
    %147 = arith.mulf %142, %146 : vector<4x256xf32>
    %148 = vector.broadcast %3 : vector<4x1xf32> to vector<4x256xf32>
    %149 = arith.mulf %147, %148 : vector<4x256xf32>
    %c0_48 = arith.constant 0 : index
    %c0_49 = arith.constant 0 : index
    %c0_50 = arith.constant 0 : index
    %150 = vector.load %arg6[%c0_48, %c0_49, %c0_50] : memref<1x4x256xf32, #tpu.memory_space<vmem>>, vector<1x4x256xf32>
    %151 = vector.shape_cast %150 : vector<1x4x256xf32> to vector<4x256xf32>
    %152 = vector.shape_cast %149 : vector<4x256xf32> to vector<1x4x256xf32>
    tpu.vector_store %arg6[%c0_48, %c0_49, %c0_50], %152 {strides = array<i32>} : memref<1x4x256xf32, #tpu.memory_space<vmem>>, vector<1x4x256xf32>,
    return
  }
  func.func @transform_0(%arg0: i32) -> (i32, i32, i32) {
    %c0_i32 = arith.constant 0 : i32
    %c0_i32_0 = arith.constant 0 : i32
    %c0_i32_1 = arith.constant 0 : i32
    return %arg0, %c0_i32, %c0_i32_0 : i32, i32, i32
  }
  func.func @transform_1(%arg0: i32) -> (i32, i32) {
    %c0_i32 = arith.constant 0 : i32
    %c0_i32_0 = arith.constant 0 : i32
    %c0_i32_1 = arith.constant 0 : i32
    return %c0_i32, %c0_i32_0 : i32, i32
  }
  func.func @transform_2(%arg0: i32) -> (i32, i32) {
    %c0_i32 = arith.constant 0 : i32
    %c0_i32_0 = arith.constant 0 : i32
    %c0_i32_1 = arith.constant 0 : i32
    return %c0_i32, %c0_i32_0 : i32, i32
  }
  func.func @transform_3(%arg0: i32) -> (i32, i32) {
    %c0_i32 = arith.constant 0 : i32
    %c0_i32_0 = arith.constant 0 : i32
    %c0_i32_1 = arith.constant 0 : i32
    return %c0_i32, %c0_i32_0 : i32, i32
  }
  func.func @transform_4(%arg0: i32) -> (i32, i32) {
    %c0_i32 = arith.constant 0 : i32
    %c0_i32_0 = arith.constant 0 : i32
    %c0_i32_1 = arith.constant 0 : i32
    return %c0_i32, %c0_i32_0 : i32, i32
  }
  func.func @transform_5(%arg0: i32) -> (i32, i32, i32) {
    %c0_i32 = arith.constant 0 : i32
    %c0_i32_0 = arith.constant 0 : i32
    %c0_i32_1 = arith.constant 0 : i32
    return %arg0, %c0_i32, %c0_i32_0 : i32, i32, i32
  }
}

</mosaic_0001>

<bundles_post_ra>
// kernel: tpu_custom_call.1
= control target key start
LH: loop header
LB: loop body
LE: loop exit
PB: predicated region body
PF: predicated region fallthrough
CT: control target
= control target key end

     0   :  { %10 = vsyncpa [#allocation3], 0  ;;  %s4126_s0 = inlined_call_operand.vmem [shape: f32[2,4,256], index: 0, kind: input, shape index: {}]   ;;  %s4127_s1 = inlined_call_operand.vmem [shape: f32[384,4], index: 1, kind: input, shape index: {}]   ;;  %s4128_s2 = inlined_call_operand.vmem [shape: f32[4,128], index: 2, kind: input, shape index: {}]   ;;  %s4129_s3 = inlined_call_operand.vmem [shape: f32[4,1], index: 3, kind: input, shape index: {}]   ;;  %s4130_s4 = inlined_call_operand.vmem [shape: f32[4,1], index: 4, kind: input, shape index: {}]   ;;  %s4131_s5 = inlined_call_operand.hbm [shape: f32[2,4,256], index: 5, kind: output, shape index: {}]  }
   0x1   :  { %12 = vsyncpa [#allocation3 + $0x1], 0  ;;  %s2981_s18 = smov 0   ;;  %s2983_s19 = smov 0  }
   0x2   :  { %s2985_s20 = smov 0   ;;  %s2987_s21 = smov 0  }
   0x3 LB: > { %s3002_s22 = sadd.s32 4294967295, %s2941_s21   ;;  %s2400_s23 = sadd.s32 4294967294, %s2941_s21   ;;  %s2941_s21 = sphi %s2987_s21, %s4317_s21   ;;  %s2937_s20 = sphi %s2985_s20, %s4316_s20   ;;  %s2933_s19 = sphi %s2983_s19, %s4315_s19   ;;  %s2929_s18 = sphi %s2981_s18, %s4314_s18  }
   0x4   : > { %s3006_s24 = sadd.s32 1, %s2941_s21   ;;  %s135_s25 = sadd.s32 1, %s2937_s20 }
   0x5   : > { %s132_s26 = ssub.s32 %s2941_s21, %s3006_s24  ;;  %p145_p0 = scmp.ne.s32.totalorder %s2937_s20, %s2933_s19 }
   0x6   : > { %p133_p1 = scmp.eq.s32.totalorder %s132_s26, 0  ;;  %p146_p2 = scmp.eq.s32.totalorder %s3002_s22, 1 }
   0x7   : > { %p151_p3 = scmp.ne.s32.totalorder %s2933_s19, %s2929_s18  ;;  %p152_p4 = scmp.eq.s32.totalorder %s2400_s23, 1 }
   0x8   : > { %s3017_s27 = scalar_select %p133_p1, %s2937_s20, %s135_s25  }
   0x9   : > { %p3019_p5 = por %p146_p2, %p145_p0  ;;  %p3023_p6 = por %p152_p4, %p151_p3 }
   0xa   : > { %p2403_p7 = scmp.ge.s32.totalorder %s2941_s21, 1  ;;  %p190_p8 = scmp.lt.s32.totalorder %s2941_s21, 3 }
   0xc   : > { %p191_p9 = pnand %p2403_p7, %p190_p8 }
   0xe   : > { %194 = sbr.rel (%p191_p9) target bundleno = 2598 (0xa26), region = 40 }
  0x15   : > { %p218_p10 = scmp.lt.s32.totalorder %s3002_s22, 1  ;;  %v4132_v0 = vmov 0.0   ;;  %vm422_vm0 = vcmask 1043456   ;;  %v223_v3 = vld [vmem:[%s4127_s1] sm:$0xff]  ;;  %vm277_vm1 = vcmask 31744   ;;  %v224_v4 = vld [vmem:[%s4127_s1 + $0x8] sm:$0xff] }
  0x16   : > { %491 = vmatprep.mubr.f32.mxu0 %v4132_v0  ;;  %749 = vmatprep.mubr.f32.mxu1 %v4132_v0  ;;  %v225_v5 = vld [vmem:[%s4127_s1 + $0x10] sm:$0xff]  ;;  %v226_v6 = vld [vmem:[%s4127_s1 + $0x18] sm:$0xff]  ;;  %v227_v7 = vld [vmem:[%s4127_s1 + $0x20] sm:$0xff]  ;;  %vm2945_vm2 = vmmov 0   ;;  %s2946_s12 = smov 96   ;;  %vm987_vm3 = vcmask 261120  }
  0x17   : > { %s219_s30 = scalar_select %p218_p10, %s3002_s22, 1  ;;  %v228_v8 = vld [vmem:[%s4127_s1 + $0x28] sm:$0xff]  ;;  %v229_v9 = vld [vmem:[%s4127_s1 + $0x30] sm:$0xff]  ;;  %v230_v10 = vld [vmem:[%s4127_s1 + $0x38] sm:$0xff] }
  0x18   : > { %v231_v11 = vld [vmem:[%s4127_s1 + $0x40] sm:$0xff]  ;;  %v232_v12 = vld [vmem:[%s4127_s1 + $0x48] sm:$0xff]  ;;  %v233_v13 = vld [vmem:[%s4127_s1 + $0x50] sm:$0xff]  ;;  %s2947_s13 = smov 64   ;;  %s2948_s14 = smov 32  }
  0x19   : > { %s2486_s6 = sshll.u32 %s219_s30, 3  ;;  %v234_v14 = vld [vmem:[%s4127_s1 + $0x58] sm:$0xff]  ;;  %v235_v15 = vld [vmem:[%s4127_s1 + $0x60] sm:$0xff]  ;;  %v236_v16 = vld [vmem:[%s4127_s1 + $0x68] sm:$0xff]  ;;  %s215_s25 = sand.u32 1, %s2933_s19  }
  0x1a   : > { %s222_s9 = scalar_lea.vmem %s4126_s0, %s2486_s6  ;;  %v237_v17 = vld [vmem:[%s4127_s1 + $0x70] sm:$0xff]  ;;  %v238_v18 = vld [vmem:[%s4127_s1 + $0x78] sm:$0xff]  ;;  %v239_v19 = vld [vmem:[%s4127_s1 + $0x80] sm:$0xff]  ;;  %s2404_s26 = sshll.u32 %s215_s25, 3 }
  0x1b   : > { %v274_v1 = vld [vmem:[%s222_s9] sm:$0xff]  ;;  %v240_v20 = vld [vmem:[%s4127_s1 + $0x88] sm:$0xff]  ;;  %v241_v21 = vld [vmem:[%s4127_s1 + $0x90] sm:$0xff]  ;;  %s2487_s30 = sshll.u32 %s3002_s22, 7  ;;  %s217_s6 = scalar_lea.vmem [#allocation2], %s2404_s26 }
  0x1c   : > { %v276_v2 = vcombine.high %v274_v1, %v274_v1  ;;  %v242_v22 = vld [vmem:[%s4127_s1 + $0x98] sm:$0xff]  ;;  %v243_v23 = vld [vmem:[%s4127_s1 + $0xa0] sm:$0xff]  ;;  %v244_v24 = vld [vmem:[%s4127_s1 + $0xa8] sm:$0xff]  ;;  %s2341_s7 = sshll.u32 %s217_s6, 4  ;;  %s4084_s10 = scalar_lea.hbm %s4131_s5, %s2487_s30  ;;  %s4086_s7 = int_to_ptr.vmem [resolvable:$true] %s2341_s7 }
  0x1d   : > { %v245_v25 = vld [vmem:[%s4127_s1 + $0xb0] sm:$0xff]  ;;  %v246_v26 = vld [vmem:[%s4127_s1 + $0xb8] sm:$0xff]  ;;  %v247_v27 = vld [vmem:[%s4127_s1 + $0xc0] sm:$0xff]  ;;  %s2327_s11 = scalar_lea.sflag [#allocation3], %s215_s25  ;;  %s2950_s22 = smov [#allocation2]  }
  0x1e   : > { %2407 = vmatprep.subr.msk.mxu0 %vm422_vm0, %v276_v2  ;;  %2648 = vmatprep.subr.msk.mxu1 %vm422_vm0, %v276_v2  ;;  %v248_v28 = vld [vmem:[%s4127_s1 + $0xc8] sm:$0xff]  ;;  %v249_v29 = vld [vmem:[%s4127_s1 + $0xd0] sm:$0xff]  ;;  %v250_v30 = vld [vmem:[%s4127_s1 + $0xd8] sm:$0xff] }
  0x1f   : > { %2408 = vmatpush1.msk.msra.mxu0 %vm422_vm0, %v274_v1  ;;  %2649 = vmatpush1.msk.msra.mxu1 %vm422_vm0, %v274_v1  ;;  %v251_v31 = vld [vmem:[%s4127_s1 + $0xe0] sm:$0xff]  ;;  %v252_v32 = vld [vmem:[%s4127_s1 + $0xe8] sm:$0xff]  ;;  %v253_v33 = vld [vmem:[%s4127_s1 + $0xf0] sm:$0xff] }
  0x20   : > { %2409 = vmatmul.mubr.msk.f32.vlgmr.msra.gmra.mrb[0].mxu0 %vm277_vm1, %v223_v3  ;;  %v254_v34 = vld [vmem:[%s4127_s1 + $0xf8] sm:$0xff]  ;;  %v255_v35 = vld [vmem:[%s4127_s1 + $0x100] sm:$0xff]  ;;  %v256_v36 = vld [vmem:[%s4127_s1 + $0x108] sm:$0xff] }
  0x21   : > { %497 = vmatprep.mubr.f32.mxu0 %v4132_v0  ;;  %v257_v37 = vld [vmem:[%s4127_s1 + $0x110] sm:$0xff]  ;;  %v258_v38 = vld [vmem:[%s4127_s1 + $0x118] sm:$0xff]  ;;  %v259_v39 = vld [vmem:[%s4127_s1 + $0x120] sm:$0xff] }
  0x22   : > { %v260_v40 = vld [vmem:[%s4127_s1 + $0x128] sm:$0xff]  ;;  %v261_v41 = vld [vmem:[%s4127_s1 + $0x130] sm:$0xff]  ;;  %v262_v42 = vld [vmem:[%s4127_s1 + $0x138] sm:$0xff] }
  0x23   : > { %v263_v47 = vld [vmem:[%s4127_s1 + $0x140] sm:$0xff]  ;;  %v264_v49 = vld [vmem:[%s4127_s1 + $0x148] sm:$0xff]  ;;  %v266_v50 = vld [vmem:[%s4127_s1 + $0x158] sm:$0xff] }
  0x24   : > { %2410 = vmatmul.mubr.msk.f32.gmra.mrb[2].mxu0 %vm277_vm1, %v224_v4  ;;  %2452 = vmatmul.mubr.msk.f32.vlgmr.msra.gmra.mrb[0].mxu1 %vm277_vm1, %v266_v50  ;;  %v267_v54 = vld [vmem:[%s4127_s1 + $0x160] sm:$0xff]  ;;  %v265_v56 = vld [vmem:[%s4127_s1 + $0x150] sm:$0xff]  ;;  %v268_v60 = vld [vmem:[%s4127_s1 + $0x168] sm:$0xff] }
  0x25   : > { %503 = vmatprep.mubr.f32.mxu0 %v4132_v0  ;;  %755 = vmatprep.mubr.f32.mxu1 %v4132_v0  ;;  %vm3773_vm4 = vmpackc.low %vm987_vm3, %vm987_vm3 }
  0x28   : > { %2411 = vmatmul.mubr.msk.f32.gmra.mrb[4].mxu0 %vm277_vm1, %v225_v5  ;;  %2453 = vmatmul.mubr.msk.f32.gmra.mrb[2].mxu1 %vm277_vm1, %v267_v54 }
  0x29   : > { %509 = vmatprep.mubr.f32.mxu0 %v4132_v0  ;;  %761 = vmatprep.mubr.f32.mxu1 %v4132_v0 }
  0x2c   : > { %2412 = vmatmul.mubr.msk.f32.gmra.mrb[6].mxu0 %vm277_vm1, %v226_v6  ;;  %2454 = vmatmul.mubr.msk.f32.gmra.mrb[4].mxu1 %vm277_vm1, %v268_v60 }
  0x2d   : > { %515 = vmatprep.mubr.f32.mxu0 %v4132_v0  ;;  %767 = vmatprep.mubr.f32.mxu1 %v4132_v0 }
  0x30   : > { %2413 = vmatmul.mubr.msk.f32.gmra.mrb[8].mxu0 %vm277_vm1, %v227_v7 }
  0x31   : > { %521 = vmatprep.mubr.f32.mxu0 %v4132_v0 }
  0x34   : > { %2414 = vmatmul.mubr.msk.f32.gmra.mrb[10].mxu0 %vm277_vm1, %v228_v8 }
  0x35   : > { %527 = vmatprep.mubr.f32.mxu0 %v4132_v0 }
  0x38   : > { %2415 = vmatmul.mubr.msk.f32.gmra.mrb[12].mxu0 %vm277_vm1, %v229_v9 }
  0x39   : > { %533 = vmatprep.mubr.f32.mxu0 %v4132_v0 }
  0x3c   : > { %2416 = vmatmul.mubr.msk.f32.gmra.mrb[14].mxu0 %vm277_vm1, %v230_v10 }
  0x3d   : > { %539 = vmatprep.mubr.f32.mxu0 %v4132_v0 }
  0x40   : > { %2417 = vmatmul.mubr.msk.f32.gmra.mrb[16].mxu0 %vm277_vm1, %v231_v11 }
  0x41   : > { %545 = vmatprep.mubr.f32.mxu0 %v4132_v0 }
  0x44   : > { %2418 = vmatmul.mubr.msk.f32.gmra.mrb[18].mxu0 %vm277_vm1, %v232_v12 }
  0x45   : > { %551 = vmatprep.mubr.f32.mxu0 %v4132_v0 }
  0x48   : > { %2419 = vmatmul.mubr.msk.f32.gmra.mrb[20].mxu0 %vm277_vm1, %v233_v13 }
  0x49   : > { %557 = vmatprep.mubr.f32.mxu0 %v4132_v0 }
  0x4c   : > { %2420 = vmatmul.mubr.msk.f32.gmra.mrb[22].mxu0 %vm277_vm1, %v234_v14 }
  0x4d   : > { %563 = vmatprep.mubr.f32.mxu0 %v4132_v0 }
  0x50   : > { %2421 = vmatmul.mubr.msk.f32.gmra.mrb[24].mxu0 %vm277_vm1, %v235_v15 }
  0x51   : > { %569 = vmatprep.mubr.f32.mxu0 %v4132_v0 }
  0x54   : > { %2422 = vmatmul.mubr.msk.f32.gmra.mrb[26].mxu0 %vm277_vm1, %v236_v16 }
  0x55   : > { %575 = vmatprep.mubr.f32.mxu0 %v4132_v0 }
  0x58   : > { %2423 = vmatmul.mubr.msk.f32.gmra.mrb[28].mxu0 %vm277_vm1, %v237_v17 }
  0x59   : > { %581 = vmatprep.mubr.f32.mxu0 %v4132_v0 }
  0x5c   : > { %2424 = vmatmul.mubr.msk.f32.gmra.mrb[30].mxu0 %vm277_vm1, %v238_v18 }
  0x5d   : > { %587 = vmatprep.mubr.f32.mxu0 %v4132_v0 }
  0x60   : > { %2425 = vmatmul.mubr.msk.f32.gmra.mrb[32].mxu0 %vm277_vm1, %v239_v19 }
  0x61   : > { %593 = vmatprep.mubr.f32.mxu0 %v4132_v0 }
  0x64   : > { %2426 = vmatmul.mubr.msk.f32.gmra.mrb[34].mxu0 %vm277_vm1, %v240_v20 }
  0x65   : > { %599 = vmatprep.mubr.f32.mxu0 %v4132_v0 }
  0x68   : > { %2427 = vmatmul.mubr.msk.f32.gmra.mrb[36].mxu0 %vm277_vm1, %v241_v21 }
  0x69   : > { %605 = vmatprep.mubr.f32.mxu0 %v4132_v0 }
  0x6c   : > { %2428 = vmatmul.mubr.msk.f32.gmra.mrb[38].mxu0 %vm277_vm1, %v242_v22 }
  0x6d   : > { %611 = vmatprep.mubr.f32.mxu0 %v4132_v0 }
  0x70   : > { %2429 = vmatmul.mubr.msk.f32.gmra.mrb[40].mxu0 %vm277_vm1, %v243_v23 }
  0x71   : > { %617 = vmatprep.mubr.f32.mxu0 %v4132_v0 }
  0x74   : > { %2430 = vmatmul.mubr.msk.f32.gmra.mrb[42].mxu0 %vm277_vm1, %v244_v24 }
  0x75   : > { %623 = vmatprep.mubr.f32.mxu0 %v4132_v0 }
  0x78   : > { %2431 = vmatmul.mubr.msk.f32.gmra.mrb[44].mxu0 %vm277_vm1, %v245_v25 }
  0x79   : > { %629 = vmatprep.mubr.f32.mxu0 %v4132_v0 }
  0x7c   : > { %2432 = vmatmul.mubr.msk.f32.gmra.mrb[46].mxu0 %vm277_vm1, %v246_v26 }
  0x7d   : > { %635 = vmatprep.mubr.f32.mxu0 %v4132_v0 }
  0x80   : > { %2433 = vmatmul.mubr.msk.f32.gmra.mrb[48].mxu0 %vm277_vm1, %v247_v27 }
  0x81   : > { %641 = vmatprep.mubr.f32.mxu0 %v4132_v0 }
  0x84   : > { %2434 = vmatmul.mubr.msk.f32.gmra.mrb[50].mxu0 %vm277_vm1, %v248_v28 }
  0x85   : > { %647 = vmatprep.mubr.f32.mxu0 %v4132_v0 }
  0x88   : > { %2435 = vmatmul.mubr.msk.f32.gmra.mrb[52].mxu0 %vm277_vm1, %v249_v29 }
  0x89   : > { %653 = vmatprep.mubr.f32.mxu0 %v4132_v0 }
  0x8c   : > { %2436 = vmatmul.mubr.msk.f32.gmra.mrb[54].mxu0 %vm277_vm1, %v250_v30 }
  0x8d   : > { %659 = vmatprep.mubr.f32.mxu0 %v4132_v0 }
  0x90   : > { %2437 = vmatmul.mubr.msk.f32.gmra.mrb[56].mxu0 %vm277_vm1, %v251_v31 }
  0x91   : > { %665 = vmatprep.mubr.f32.mxu0 %v4132_v0 }
  0x94   : > { %2438 = vmatmul.mubr.msk.f32.gmra.mrb[58].mxu0 %vm277_vm1, %v252_v32 }
  0x95   : > { %671 = vmatprep.mubr.f32.mxu0 %v4132_v0 }
  0x98   : > { %2439 = vmatmul.mubr.msk.f32.gmra.mrb[60].mxu0 %vm277_vm1, %v253_v33 }
  0x99   : > { %677 = vmatprep.mubr.f32.mxu0 %v4132_v0 }
  0x9c   : > { %2440 = vmatmul.mubr.msk.f32.gmra.mrb[62].mxu0 %vm277_vm1, %v254_v34 }
  0x9d   : > { %683 = vmatprep.mubr.f32.mxu0 %v4132_v0 }
  0xa0   : > { %2441 = vmatmul.mubr.msk.f32.gmra.mrb[64].mxu0 %vm277_vm1, %v255_v35 }
  0xa1   : > { %689 = vmatprep.mubr.f32.mxu0 %v4132_v0 }
  0xa4   : > { %2442 = vmatmul.mubr.msk.f32.gmra.mrb[66].mxu0 %vm277_vm1, %v256_v36 }
  0xa5   : > { %695 = vmatprep.mubr.f32.mxu0 %v4132_v0 }
  0xa8   : > { %2443 = vmatmul.mubr.msk.f32.gmra.mrb[68].mxu0 %vm277_vm1, %v257_v37 }
  0xa9   : > { %701 = vmatprep.mubr.f32.mxu0 %v4132_v0 }
  0xac   : > { %2444 = vmatmul.mubr.msk.f32.gmra.mrb[70].mxu0 %vm277_vm1, %v258_v38 }
  0xad   : > { %707 = vmatprep.mubr.f32.mxu0 %v4132_v0 }
  0xb0   : > { %2445 = vmatmul.mubr.msk.f32.gmra.mrb[72].mxu0 %vm277_vm1, %v259_v39 }
  0xb1   : > { %713 = vmatprep.mubr.f32.mxu0 %v4132_v0 }
  0xb4   : > { %2446 = vmatmul.mubr.msk.f32.gmra.mrb[74].mxu0 %vm277_vm1, %v260_v40 }
  0xb5   : > { %719 = vmatprep.mubr.f32.mxu0 %v4132_v0 }
  0xb8   : > { %2447 = vmatmul.mubr.msk.f32.gmra.mrb[76].mxu0 %vm277_vm1, %v261_v41 }
  0xb9   : > { %725 = vmatprep.mubr.f32.mxu0 %v4132_v0 }
  0xbc   : > { %2448 = vmatmul.mubr.msk.f32.gmra.mrb[78].mxu0 %vm277_vm1, %v262_v42 }
  0xbd   : > { %731 = vmatprep.mubr.f32.mxu0 %v4132_v0 }
  0xc0   : > { %2449 = vmatmul.mubr.msk.f32.gmra.mrb[80].mxu0 %vm277_vm1, %v263_v47 }
  0xc1   : > { %737 = vmatprep.mubr.f32.mxu0 %v4132_v0 }
  0xc4   : > { %2450 = vmatmul.mubr.msk.f32.gmra.mrb[82].mxu0 %vm277_vm1, %v264_v49 }
  0xc5   : > { %743 = vmatprep.mubr.f32.mxu0 %v4132_v0 }
  0xc8   : > { %2451 = vmatmul.mubr.msk.f32.gmra.mrb[84].mxu0 %vm277_vm1, %v265_v56 }
  0xf3   : > { %v493_v43 = vpop.f32.mrb[0].mxu0 }
  0xf4   : > { %v3240_v44 = vpop.f32.mrb[1].mxu0 }
  0xf7   : > { %v499_v45 = vpop.f32.mrb[2].mxu0 }
  0xf8   : > { %v3242_v46 = vpop.f32.mrb[3].mxu0 }
  0xfb   : > { %v505_v48 = vpop.f32.mrb[4].mxu0 }
  0xfc   : > { %v780_v51 = vmax.f32 %v493_v43, %v505_v48  ;;  %v3255_v52 = vpop.f32.mrb[5].mxu0 }
  0xfd   : > { %v789_v53 = vmax.f32 %v3240_v44, %v3255_v52 }
  0xff   : > { %v511_v55 = vpop.f32.mrb[6].mxu0 }
 0x100   : > { %v781_v57 = vmax.f32 %v499_v45, %v511_v55  ;;  %v513_v58 = vpop.f32.mrb[7].mxu0 }
 0x101   : > { %v790_v59 = vmax.f32 %v3242_v46, %v513_v58 }
 0x102   : > { %v782_v61 = vmax.f32 %v780_v51, %v781_v57 }
 0x103   : > { %v791_v62 = vmax.f32 %v789_v53, %v790_v59  ;;  %v3276_v63 = vpop.f32.mrb[8].mxu0 }
 0x104   : > { %v783_v1 = vrot.slane %v782_v61, 4  ;;  %v3278_v2 = vpop.f32.mrb[9].mxu0 }
 0x105   : > { %v792_v3 = vrot.slane %v791_v62, 4 }
 0x106   : > { %v784_v4 = vmax.f32 %v782_v61, %v783_v1 }
 0x107   : > { %v793_v5 = vmax.f32 %v791_v62, %v792_v3  ;;  %v3282_v6 = vpop.f32.mrb[10].mxu0 }
 0x108   : > { %v785_v7 = vrot.slane %v784_v4, 2  ;;  %v3284_v8 = vpop.f32.mrb[11].mxu0 }
 0x109   : > { %v794_v9 = vrot.slane %v793_v5, 2 }
 0x10a   : > { %v786_v10 = vmax.f32 %v784_v4, %v785_v7 }
 0x10b   : > { %v795_v11 = vmax.f32 %v793_v5, %v794_v9  ;;  %v3286_v12 = vpop.f32.mrb[12].mxu0 }
 0x10c   : > { %v787_v13 = vrot.slane %v786_v10, 1  ;;  %v1151_v14 = vmax.f32 %v3276_v63, %v3286_v12  ;;  %v3290_v15 = vpop.f32.mrb[13].mxu0 }
 0x10d   : > { %v796_v16 = vrot.slane %v795_v11, 1  ;;  %v1160_v17 = vmax.f32 %v3278_v2, %v3290_v15 }
 0x10e   : > { %v788_v18 = vmax.f32 %v786_v10, %v787_v13 }
 0x10f   : > { %v797_v19 = vmax.f32 %v795_v11, %v796_v16  ;;  %v3294_v20 = vpop.f32.mrb[14].mxu0 }
 0x110   : > { %v798_v21 = vsub.f32 %v493_v43, %v788_v18  ;;  %v800_v22 = vsub.f32 %v499_v45, %v788_v18  ;;  %v802_v23 = vsub.f32 %v505_v48, %v788_v18  ;;  %v804_v24 = vsub.f32 %v511_v55, %v788_v18  ;;  %v3296_v25 = vpop.f32.mrb[15].mxu0 }
 0x111   : > { %v799_v26 = vsub.f32 %v3240_v44, %v797_v19  ;;  %v801_v27 = vsub.f32 %v3242_v46, %v797_v19  ;;  %v803_v28 = vsub.f32 %v3255_v52, %v797_v19  ;;  %v805_v29 = vsub.f32 %v513_v58, %v797_v19 }
 0x112   : > { %v806_v30 = vmul.f32 1.442695, %v798_v21  ;;  %v810_v31 = vmul.f32 1.442695, %v800_v22  ;;  %v814_v32 = vmul.f32 1.442695, %v802_v23  ;;  %v1152_v33 = vmax.f32 %v3282_v6, %v3294_v20 }
 0x113   : > { %v818_v34 = vmul.f32 1.442695, %v804_v24  ;;  %v1161_v35 = vmax.f32 %v3284_v8, %v3296_v25  ;;  %v808_v36 = vmul.f32 1.442695, %v799_v26  ;;  %v3305_v38 = vpop.f32.mrb[16].mxu0 }
 0x114   : > { %2699 = vpow2.f32 %v806_v30  ;;  %v1153_v37 = vmax.f32 %v1151_v14, %v1152_v33  ;;  %v812_v39 = vmul.f32 1.442695, %v801_v27  ;;  %v3307_v41 = vpop.f32.mrb[17].mxu0  ;;  %v816_v43 = vmul.f32 1.442695, %v803_v28 }
 0x115   : > { %2701 = vpow2.f32 %v810_v31  ;;  %v1162_v40 = vmax.f32 %v1160_v17, %v1161_v35  ;;  %v820_v46 = vmul.f32 1.442695, %v805_v29 }
 0x116   : > { %2703 = vpow2.f32 %v814_v32  ;;  %v1154_v42 = vrot.slane %v1153_v37, 4 }
 0x117   : > { %2705 = vpow2.f32 %v818_v34  ;;  %v1163_v44 = vrot.slane %v1162_v40, 4  ;;  %v3309_v45 = vpop.f32.mrb[18].mxu0 }
 0x118   : > { %2707 = vpow2.f32 %v808_v36  ;;  %v1155_v47 = vmax.f32 %v1153_v37, %v1154_v42  ;;  %v3311_v48 = vpop.f32.mrb[19].mxu0 }
 0x119   : > { %2709 = vpow2.f32 %v812_v39  ;;  %v1164_v49 = vmax.f32 %v1162_v40, %v1163_v44 }
 0x11a   : > { %v1156_v50 = vrot.slane %v1155_v47, 2  ;;  %2711 = vpow2.f32 %v816_v43 }
 0x11b   : > { %v1165_v51 = vrot.slane %v1164_v49, 2  ;;  %v3313_v52 = vpop.f32.mrb[20].mxu0  ;;  %2713 = vpow2.f32 %v820_v46 }
 0x11c   : > { %v1157_v53 = vmax.f32 %v1155_v47, %v1156_v50  ;;  %v1522_v54 = vmax.f32 %v3305_v38, %v3313_v52  ;;  %v3317_v55 = vpop.f32.mrb[21].mxu0 }
 0x11d   : > { %v1166_v56 = vmax.f32 %v1164_v49, %v1165_v51  ;;  %v1531_v57 = vmax.f32 %v3307_v41, %v3317_v55 }
 0x11e   : > { %v3321_v58 = vpop.eup %2699  ;;  %v1158_v59 = vrot.slane %v1157_v53, 1 }
 0x11f   : > { %v3323_v60 = vpop.eup %2701  ;;  %v1167_v61 = vrot.slane %v1166_v56, 1  ;;  %v3325_v62 = vpop.f32.mrb[22].mxu0 }
 0x120   : > { %v3327_v1 = vpop.eup %2703  ;;  %v822_v3 = vadd.f32 %v3323_v60, %v3321_v58  ;;  %v1159_v4 = vmax.f32 %v1157_v53, %v1158_v59  ;;  %v1523_v5 = vmax.f32 %v3309_v45, %v3325_v62  ;;  %v3333_v7 = vpop.f32.mrb[23].mxu0 }
 0x121   : > { %v3337_v10 = vpop.eup %2705  ;;  %v1168_v11 = vmax.f32 %v1166_v56, %v1167_v61  ;;  %v1532_v13 = vmax.f32 %v3311_v48, %v3333_v7 }
 0x122   : > { %v3341_v14 = vpop.eup %2707  ;;  %v823_v16 = vadd.f32 %v3327_v1, %v822_v3  ;;  %v1169_v17 = vsub.f32 %v3276_v63, %v1159_v4  ;;  %v1171_v18 = vsub.f32 %v3282_v6, %v1159_v4  ;;  %v1173_v19 = vsub.f32 %v3286_v12, %v1159_v4 }
 0x123   : > { %v3347_v21 = vpop.eup %2709  ;;  %v1175_v22 = vsub.f32 %v3294_v20, %v1159_v4  ;;  %v1170_v23 = vsub.f32 %v3278_v2, %v1168_v11  ;;  %v1172_v24 = vsub.f32 %v3284_v8, %v1168_v11  ;;  %v1174_v26 = vsub.f32 %v3290_v15, %v1168_v11  ;;  %v3353_v27 = vpop.f32.mrb[24].mxu0 }
 0x124   : > { %v3356_v28 = vadd.f32 %v3337_v10, %v823_v16  ;;  %v831_v63 = vadd.f32 %v3347_v21, %v3341_v14  ;;  %v1177_v6 = vmul.f32 1.442695, %v1169_v17  ;;  %v1181_v12 = vmul.f32 1.442695, %v1171_v18  ;;  %v3360_v29 = vpop.f32.mrb[25].mxu0  ;;  %v3362_v30 = vpop.eup %2711 }
 0x125   : > { %v1185_v20 = vmul.f32 1.442695, %v1173_v19  ;;  %v1189_v2 = vmul.f32 1.442695, %v1175_v22  ;;  %v1176_v8 = vsub.f32 %v3296_v25, %v1168_v11  ;;  %v3365_v31 = vpop.eup %2713  ;;  %v1179_v32 = vmul.f32 1.442695, %v1170_v23 }
 0x126   : > { %v832_v15 = vadd.f32 %v3362_v30, %v831_v63  ;;  %2715 = vpow2.f32 %v1177_v6  ;;  %v1183_v33 = vmul.f32 1.442695, %v1172_v24  ;;  %v1524_v34 = vmax.f32 %v1522_v54, %v1523_v5 }
 0x127   : > { %2717 = vpow2.f32 %v1181_v12  ;;  %v3368_v35 = vpop.f32.mrb[26].mxu0  ;;  %v1187_v37 = vmul.f32 1.442695, %v1174_v26  ;;  %v1533_v39 = vmax.f32 %v1531_v57, %v1532_v13  ;;  %v1191_v47 = vmul.f32 1.442695, %v1176_v8 }
 0x128   : > { %v3371_v36 = vadd.f32 %v3365_v31, %v832_v15  ;;  %2719 = vpow2.f32 %v1185_v20  ;;  %v3373_v40 = vpop.f32.mrb[27].mxu0  ;;  %v1525_v25 = vrot.slane %v1524_v34, 4 }
 0x129   : > { %2721 = vpow2.f32 %v1189_v2  ;;  %v1534_v44 = vrot.slane %v1533_v39, 4 }
 0x12a   : > { %2723 = vpow2.f32 %v1179_v32  ;;  %v1526_v49 = vmax.f32 %v1524_v34, %v1525_v25 }
 0x12b   : > { %2725 = vpow2.f32 %v1183_v33  ;;  %v3381_v50 = vpop.f32.mrb[28].mxu0  ;;  %v1535_v51 = vmax.f32 %v1533_v39, %v1534_v44 }
 0x12c   : > { %v1893_v53 = vmax.f32 %v3353_v27, %v3381_v50  ;;  %v3385_v54 = vpop.f32.mrb[29].mxu0  ;;  %2727 = vpow2.f32 %v1187_v37  ;;  %v1527_v56 = vrot.slane %v1526_v49, 2 }
 0x12d   : > { %v1902_v57 = vmax.f32 %v3360_v29, %v3385_v54  ;;  %v1536_v59 = vrot.slane %v1535_v51, 2  ;;  %2729 = vpow2.f32 %v1191_v47 }
 0x12e   : > { %v1528_v61 = vmax.f32 %v1526_v49, %v1527_v56 }
 0x12f   : > { %v3389_v3 = vpop.f32.mrb[30].mxu0  ;;  %v1537_v5 = vmax.f32 %v1535_v51, %v1536_v59 }
 0x130   : > { %v3391_v4 = vpop.eup %2715  ;;  %v1894_v11 = vmax.f32 %v3368_v35, %v3389_v3  ;;  %v3395_v13 = vpop.f32.mrb[31].mxu0  ;;  %v1529_v17 = vrot.slane %v1528_v61, 1 }
 0x131   : > { %4182 = vst [vmem:[#allocation5_spill] sm:$0xff] %v3391_v4  ;;  %v3397_v16 = vpop.eup %2717  ;;  %v1903_v18 = vmax.f32 %v3373_v40, %v3395_v13  ;;  %v1538_v23 = vrot.slane %v1537_v5, 1 }
 0x132   : > { %4183 = vst [vmem:[#allocation6_spill] sm:$0xff] %v3397_v16  ;;  %v3401_v19 = vpop.eup %2719  ;;  %v1193_v22 = vadd.f32 %v3397_v16, %v3391_v4  ;;  %v1895_v24 = vmax.f32 %v1893_v53, %v1894_v11  ;;  %v1530_v63 = vmax.f32 %v1528_v61, %v1529_v17 }
 0x133   : > { %4184 = vst [vmem:[#allocation7_spill] sm:$0xff] %v3401_v19  ;;  %v3405_v26 = vpop.eup %2721  ;;  %v1904_v6 = vmax.f32 %v1902_v57, %v1903_v18  ;;  %v3407_v12 = vpop.f32.mrb[32].mxu0  ;;  %v1539_v15 = vmax.f32 %v1537_v5, %v1538_v23 }
 0x134   : > { %4185 = vst [vmem:[#allocation8_spill] sm:$0xff] %v3405_v26  ;;  %v3411_v2 = vpop.eup %2723  ;;  %v1194_v8 = vadd.f32 %v3401_v19, %v1193_v22  ;;  %v1896_v32 = vrot.slane %v1895_v24, 4  ;;  %v3414_v33 = vpop.f32.mrb[33].mxu0  ;;  %v1540_v37 = vsub.f32 %v3305_v38, %v1530_v63  ;;  %v1542_v39 = vsub.f32 %v3309_v45, %v1530_v63 }
 0x135   : > { %v3416_v34 = vpop.eup %2725  ;;  %v1544_v25 = vsub.f32 %v3313_v52, %v1530_v63  ;;  %v1546_v44 = vsub.f32 %v3325_v62, %v1530_v63  ;;  %v1541_v51 = vsub.f32 %v3307_v41, %v1539_v15  ;;  %v1543_v53 = vsub.f32 %v3311_v48, %v1539_v15 }
 0x136   : > { %v3423_v47 = vadd.f32 %v3405_v26, %v1194_v8  ;;  %v1202_v49 = vadd.f32 %v3416_v34, %v3411_v2  ;;  %v3429_v56 = vpop.eup %2727  ;;  %v1548_v57 = vmul.f32 1.442695, %v1540_v37  ;;  %v1552_v38 = vmul.f32 1.442695, %v1542_v39 }
 0x137   : > { %4187 = vst [vmem:[#allocation10_spill] sm:$0xff] %v3429_v56  ;;  %v1556_v59 = vmul.f32 1.442695, %v1544_v25  ;;  %v1545_v45 = vsub.f32 %v3317_v55, %v1539_v15  ;;  %v1560_v62 = vmul.f32 1.442695, %v1546_v44  ;;  %v1547_v61 = vsub.f32 %v3333_v7, %v1539_v15  ;;  %v3434_v5 = vpop.f32.mrb[34].mxu0  ;;  %v3436_v11 = vpop.eup %2729 }
 0x138   : > { %4186 = vst [vmem:[#allocation9_spill] sm:$0xff] %v3423_v47  ;;  %v1203_v52 = vadd.f32 %v3429_v56, %v1202_v49  ;;  %4188 = vst [vmem:[#allocation11_spill] sm:$0xff] %v3436_v11  ;;  %2731 = vpow2.f32 %v1548_v57  ;;  %v1550_v41 = vmul.f32 1.442695, %v1541_v51  ;;  %v1554_v17 = vmul.f32 1.442695, %v1543_v53 }
 0x139   : > { %2733 = vpow2.f32 %v1552_v38  ;;  %v1558_v18 = vmul.f32 1.442695, %v1545_v45  ;;  %v3441_v22 = vpop.f32.mrb[35].mxu0  ;;  %v1897_v55 = vmax.f32 %v1895_v24, %v1896_v32  ;;  %v1905_v23 = vrot.slane %v1904_v6, 4 }
 0x13a   : > { %v3439_v48 = vadd.f32 %v3436_v11, %v1203_v52  ;;  %2735 = vpow2.f32 %v1556_v59  ;;  %v842_v7 = vmax.f32 %v3407_v12, %v3414_v33  ;;  %v1562_v8 = vmul.f32 1.442695, %v1547_v61 }
 0x13b   : > { %v3445_v63 = vpop.f32.mrb[36].mxu0  ;;  %2737 = vpow2.f32 %v1560_v62  ;;  %v845_v15 = vmax.f32 %v3434_v5, %v3441_v22  ;;  %v1898_v25 = vrot.slane %v1897_v55, 2  ;;  %v1906_v44 = vmax.f32 %v1904_v6, %v1905_v23 }
 0x13c   : > { %4189 = vst [vmem:[#allocation12_spill] sm:$0xff] %v3439_v48  ;;  %v3449_v37 = vpop.f32.mrb[37].mxu0  ;;  %2739 = vpow2.f32 %v1550_v41  ;;  %843 = vmax.xlane.f32.xlu0 %v842_v7 }
 0x13d   : > { %v848_v24 = vmax.f32 %v3445_v63, %v3449_v37  ;;  %2741 = vpow2.f32 %v1554_v17  ;;  %v1899_v51 = vmax.f32 %v1897_v55, %v1898_v25  ;;  %v1907_v53 = vrot.slane %v1906_v44, 2 }
 0x13e   : > { %2743 = vpow2.f32 %v1558_v18 }
 0x13f   : > { %849 = vmax.xlane.f32.xlu1 %v848_v24  ;;  %v3459_v57 = vpop.f32.mrb[38].mxu0  ;;  %2745 = vpow2.f32 %v1562_v8  ;;  %v1900_v6 = vrot.slane %v1899_v51, 1  ;;  %v1908_v59 = vmax.f32 %v1906_v44, %v1907_v53 }
 0x140   : > { %v3461_v38 = vpop.f32.mrb[39].mxu0  ;;  %846 = vmax.xlane.f32.xlu0 %v845_v15 }
 0x141   : > { %v851_v45 = vmax.f32 %v3459_v57, %v3461_v38  ;;  %v1901_v62 = vmax.f32 %v1899_v51, %v1900_v6  ;;  %v1909_v61 = vrot.slane %v1908_v59, 1 }
 0x142   : > { %v3465_v52 = vpop.eup %2731 }
 0x143   : > { %4190 = vst [vmem:[#allocation13_spill] sm:$0xff] %v3465_v52  ;;  %852 = vmax.xlane.f32.xlu1 %v851_v45  ;;  %v3467_v41 = vpop.f32.mrb[40].mxu0  ;;  %v3469_v17 = vpop.eup %2733  ;;  %v1911_v7 = vsub.f32 %v3353_v27, %v1901_v62  ;;  %v1913_v8 = vsub.f32 %v3368_v35, %v1901_v62  ;;  %v1915_v15 = vsub.f32 %v3381_v50, %v1901_v62 }
 0x144   : > { %4191 = vst [vmem:[#allocation14_spill] sm:$0xff] %v3469_v17  ;;  %v3471_v55 = vpop.f32.mrb[41].mxu0  ;;  %v3473_v18 = vpop.eup %2735  ;;  %v1564_v23 = vadd.f32 %v3469_v17, %v3465_v52  ;;  %v1917_v44 = vsub.f32 %v3389_v3, %v1901_v62  ;;  %v1910_v24 = vmax.f32 %v1908_v59, %v1909_v61 }
 0x145   : > { %4192 = vst [vmem:[#allocation15_spill] sm:$0xff] %v3473_v18  ;;  %v3480_v25 = vpop.eup %2737  ;;  %v1919_v45 = vmul.f32 1.442695, %v1911_v7  ;;  %v1923_v49 = vmul.f32 1.442695, %v1913_v8 }
 0x146   : > { %4193 = vst [vmem:[#allocation16_spill] sm:$0xff] %v3480_v25  ;;  %v3485_v53 = vpop.eup %2739  ;;  %v1565_v6 = vadd.f32 %v3473_v18, %v1564_v23  ;;  %v1927_v32 = vmul.f32 1.442695, %v1915_v15  ;;  %v1931_v35 = vmul.f32 1.442695, %v1917_v44  ;;  %v1912_v50 = vsub.f32 %v3360_v29, %v1910_v24 }
 0x147   : > { %4194 = vst [vmem:[#allocation17_spill] sm:$0xff] %v3485_v53  ;;  %v3488_v27 = vpop.eup %2741  ;;  %v1914_v20 = vsub.f32 %v3373_v40, %v1910_v24  ;;  %v1916_v3 = vsub.f32 %v3385_v54, %v1910_v24  ;;  %v3493_v59 = vpop.f32.mrb[42].mxu0  ;;  %2747 = vpow2.f32 %v1919_v45  ;;  %v1918_v23 = vsub.f32 %v3395_v13, %v1910_v24 }
 0x148   : > { %4195 = vst [vmem:[#allocation18_spill] sm:$0xff] %v3488_v27  ;;  %v3496_v62 = vadd.f32 %v3480_v25, %v1565_v6  ;;  %v1573_v61 = vadd.f32 %v3488_v27, %v3485_v53  ;;  %v3501_v7 = vpop.f32.mrb[43].mxu0  ;;  %v3503_v8 = vpop.eup %2743  ;;  %2749 = vpow2.f32 %v1923_v49  ;;  %v1921_v29 = vmul.f32 1.442695, %v1912_v50  ;;  %v270_v50 = vld [vmem:[%s4127_s1 + $0x178] sm:$0xff] }
 0x149   : > { %4197 = vst [vmem:[#allocation20_spill] sm:$0xff] %v3503_v8  ;;  %v1925_v40 = vmul.f32 1.442695, %v1914_v20  ;;  %v3505_v15 = vpop.eup %2745  ;;  %2751 = vpow2.f32 %v1927_v32  ;;  %v1929_v44 = vmul.f32 1.442695, %v1916_v3 }
 0x14a   : > { %4196 = vst [vmem:[#allocation19_spill] sm:$0xff] %v3496_v62  ;;  %4198 = vst [vmem:[#allocation21_spill] sm:$0xff] %v3505_v15  ;;  %v1574_v54 = vadd.f32 %v3503_v8, %v1573_v61  ;;  %2753 = vpow2.f32 %v1931_v35  ;;  %v1933_v39 = vmul.f32 1.442695, %v1918_v23  ;;  %v269_v23 = vld [vmem:[%s4127_s1 + $0x170] sm:$0xff] }
 0x14b   : > { %v3508_v6 = vpop.f32.mrb[44].mxu0  ;;  %2755 = vpow2.f32 %v1921_v29  ;;  %2455 = vmatmul.mubr.msk.f32.gmra.mrb[6].mxu1 %vm277_vm1, %v269_v23 }
 0x14c   : > { %v3510_v45 = vpop.f32.mrb[45].mxu0  ;;  %v3517_v20 = vadd.f32 %v3505_v15, %v1574_v54  ;;  %2757 = vpow2.f32 %v1925_v40  ;;  %773 = vmatprep.mubr.f32.mxu1 %v4132_v0 }
 0x14d   : > { %2759 = vpow2.f32 %v1929_v44 }
 0x14e   : > { %4199 = vst [vmem:[#allocation22_spill] sm:$0xff] %v3517_v20  ;;  %2761 = vpow2.f32 %v1933_v39 }
 0x14f   : > { %v3527_v3 = vpop.f32.mrb[46].mxu0  ;;  %2456 = vmatmul.mubr.msk.f32.gmra.mrb[8].mxu1 %vm277_vm1, %v270_v50 }
 0x150   : > { %v3529_v61 = vpop.f32.mrb[47].mxu0 }
 0x151   : > { %v3538_v40 = vpop.eup %2747 }
 0x152   : > { %4200 = vst [vmem:[#allocation23_spill] sm:$0xff] %v3538_v40  ;;  %v3542_v44 = vpop.eup %2749 }
 0x153   : > { %v3540_v54 = vpop.f32.mrb[48].mxu0  ;;  %4201 = vst [vmem:[#allocation24_spill] sm:$0xff] %v3542_v44  ;;  %v3549_v35 = vpop.eup %2751  ;;  %v1935_v23 = vadd.f32 %v3542_v44, %v3538_v40 }
 0x154   : > { %v3544_v39 = vpop.f32.mrb[49].mxu0  ;;  %4202 = vst [vmem:[#allocation25_spill] sm:$0xff] %v3549_v35  ;;  %v3556_v49 = vpop.eup %2753 }
 0x155   : > { %4203 = vst [vmem:[#allocation26_spill] sm:$0xff] %v3556_v49  ;;  %v3560_v43 = vpop.eup %2755  ;;  %v1936_v9 = vadd.f32 %v3549_v35, %v1935_v23 }
 0x156   : > { %4204 = vst [vmem:[#allocation27_spill] sm:$0xff] %v3560_v43  ;;  %v3567_v29 = vpop.eup %2757 }
 0x157   : > { %v3563_v42 = vpop.f32.mrb[50].mxu0  ;;  %4205 = vst [vmem:[#allocation28_spill] sm:$0xff] %v3567_v29  ;;  %v3571_v32 = vpop.eup %2759  ;;  %v3574_v24 = vadd.f32 %v3556_v49, %v1936_v9  ;;  %v1944_v46 = vadd.f32 %v3567_v29, %v3560_v43 }
 0x158   : > { %v3569_v50 = vpop.f32.mrb[51].mxu0  ;;  %4206 = vst [vmem:[#allocation29_spill] sm:$0xff] %v3571_v32  ;;  %v3580_v13 = vpop.eup %2761 }
 0x159   : > { %4207 = vst [vmem:[#allocation30_spill] sm:$0xff] %v3574_v24  ;;  %4208 = vst [vmem:[#allocation31_spill] sm:$0xff] %v3580_v13  ;;  %v1945_v51 = vadd.f32 %v3571_v32, %v1944_v46 }
 0x15b   : > { %v3585_v35 = vpop.f32.mrb[52].mxu0  ;;  %v3592_v24 = vadd.f32 %v3580_v13, %v1945_v51 }
 0x15c   : > { %v3589_v9 = vpop.f32.mrb[53].mxu0 }
 0x15d   : > { %4209 = vst [vmem:[#allocation32_spill] sm:$0xff] %v3592_v24 }
 0x15f   : > { %v3596_v49 = vpop.f32.mrb[54].mxu0 }
 0x160   : > { %v3598_v44 = vpop.f32.mrb[55].mxu0 }
 0x163   : > { %v3602_v0 = vpop.f32.mrb[56].mxu0 }
 0x164   : > { %v3604_v43 = vpop.f32.mrb[57].mxu0 }
 0x167   : > { %v3608_v32 = vpop.f32.mrb[58].mxu0 }
 0x168   : > { %v3610_v51 = vpop.f32.mrb[59].mxu0 }
 0x16b   : > { %v3614_v24 = vpop.f32.mrb[60].mxu0 }
 0x16c   : > { %v3616_v13 = vpop.f32.mrb[61].mxu0 }
 0x16f   : > { %v3620_v29 = vpop.f32.mrb[62].mxu0 }
 0x170   : > { %v3622_v20 = vpop.f32.mrb[63].mxu0 }
 0x173   : > { %v685_v62 = vpop.f32.mrb[64].mxu0 }
 0x174   : > { %v687_v18 = vpop.f32.mrb[65].mxu0 }
 0x177   : > { %v691_v25 = vpop.f32.mrb[66].mxu0 }
 0x178   : > { %v2554_v8 = vpack.c.bf16 %v691_v25, %v685_v62  ;;  %v693_v15 = vpop.f32.mrb[67].mxu0 }
 0x179   : > { %v2552_v23 = vpack.c.bf16 %v693_v15, %v687_v18 }
 0x17b   : > { %2553 = vmatprep.subr.bf16.mxu1 %v2552_v23  ;;  %v697_v52 = vpop.f32.mrb[68].mxu0 }
 0x17c   : > { %2555 = vmatpush1.bf16.xpose.msra.mxu1 %v2554_v8  ;;  %v699_v17 = vpop.f32.mrb[69].mxu0 }
 0x17f   : > { %v703_v53 = vpop.f32.mrb[70].mxu0 }
 0x180   : > { %v2558_v27 = vpack.c.bf16 %v703_v53, %v697_v52  ;;  %v705_v46 = vpop.f32.mrb[71].mxu0 }
 0x181   : > { %v2556_v48 = vpack.c.bf16 %v705_v46, %v699_v17 }
 0x183   : > { %2557 = vmatprep.subr.bf16.mxu1 %v2556_v48 }
 0x184   : > { %2559 = vmatpush1.bf16.xpose.msra.mxu1 %v2558_v27 }
 0x1c9   : > { %v844_v47 = vpop.xlane.xlu0 %843 }
 0x1ca   : > { %v854_v19 = vsub.f32 %v3407_v12, %v844_v47  ;;  %v855_v40 = vsub.f32 %v3414_v33, %v844_v47 }
 0x1cc   : > { %v850_v26 = vpop.xlane.xlu1 %849  ;;  %v862_v56 = vmul.f32 1.442695, %v854_v19  ;;  %v864_v25 = vmul.f32 1.442695, %v855_v40 }
 0x1cd   : > { %v858_v18 = vsub.f32 %v3445_v63, %v850_v26  ;;  %v859_v62 = vsub.f32 %v3449_v37, %v850_v26  ;;  %v847_v8 = vpop.xlane.xlu0 %846 }
 0x1ce   : > { %2763 = vpow2.f32 %v862_v56  ;;  %v856_v52 = vsub.f32 %v3434_v5, %v847_v8  ;;  %v857_v17 = vsub.f32 %v3441_v22, %v847_v8  ;;  %v4211_v8 = vmax.f32 %v3493_v59, %v3501_v7 }
 0x1cf   : > { %v870_v48 = vmul.f32 1.442695, %v858_v18  ;;  %2765 = vpow2.f32 %v864_v25  ;;  %v872_v53 = vmul.f32 1.442695, %v859_v62  ;;  %v4210_v62 = vmax.f32 %v3467_v41, %v3471_v55 }
 0x1d0   : > { %v853_v27 = vpop.xlane.xlu1 %852  ;;  %v866_v12 = vmul.f32 1.442695, %v856_v52  ;;  %v868_v15 = vmul.f32 1.442695, %v857_v17  ;;  %v4212_v52 = vmax.f32 %v3508_v6, %v3510_v45  ;;  %v4213_v17 = vmax.f32 %v3527_v3, %v3529_v61 }
 0x1d1   : > { %2767 = vpow2.f32 %v870_v48  ;;  %v860_v19 = vsub.f32 %v3459_v57, %v853_v27  ;;  %v861_v33 = vsub.f32 %v3461_v38, %v853_v27  ;;  %v3646_v48 = vpop.f32.mrb[72].mxu0 }
 0x1d2   : > { %2769 = vpow2.f32 %v872_v53  ;;  %v3648_v53 = vpop.f32.mrb[73].mxu0 }
 0x1d3   : > { %2771 = vpow2.f32 %v866_v12  ;;  %v874_v26 = vmul.f32 1.442695, %v860_v19  ;;  %v876_v47 = vmul.f32 1.442695, %v861_v33  ;;  %v3650_v27 = vpop.f32.mrb[74].mxu0 }
 0x1d4   : > { %2773 = vpow2.f32 %v868_v15  ;;  %v3654_v15 = vpop.f32.mrb[75].mxu0 }
 0x1d5   : > { %2775 = vpow2.f32 %v874_v26  ;;  %v3658_v33 = vpop.f32.mrb[76].mxu0 }
 0x1d6   : > { %2777 = vpow2.f32 %v876_v47  ;;  %v3660_v26 = vpop.f32.mrb[77].mxu0 }
 0x1d7   : > { %v3662_v47 = vpop.f32.mrb[78].mxu0 }
 0x1d8   : > { %v2764_v56 = vpop.eup %2763 }
 0x1d9   : > { %v2766_v5 = vpop.eup %2765 }
 0x1da   : > { %958 = vmatprep.mubr.f32.mxu1 %v2766_v5  ;;  %v878_v63 = vadd.f32 %v2766_v5, %v2764_v56  ;;  %v3666_v5 = vpop.f32.mrb[79].mxu0 }
 0x1db   : > { %v2768_v22 = vpop.eup %2767  ;;  %959 = vmatmul.mubr.f32.vlgmr.msra.gmra.mrb[10].mxu1 %v2764_v56 }
 0x1dc   : > { %v2770_v37 = vpop.eup %2769  ;;  %879 = vadd.xlane.f32.xlu0 %v878_v63  ;;  %v3670_v63 = vpop.f32.mrb[80].mxu0 }
 0x1dd   : > { %v2772_v40 = vpop.eup %2771  ;;  %v884_v23 = vadd.f32 %v2770_v37, %v2768_v22  ;;  %4214 = vst [vmem:[#allocation33_spill] sm:$0xff] %v3670_v63 }
 0x1de   : > { %v2774_v57 = vpop.eup %2773 }
 0x1df   : > { %v2776_v46 = vpop.eup %2775  ;;  %963 = vmatprep.mubr.f32.mxu1 %v2774_v57  ;;  %v881_v38 = vadd.f32 %v2774_v57, %v2772_v40 }
 0x1e0   : > { %v2778_v25 = vpop.eup %2777  ;;  %964 = vmatmul.mubr.f32.gmra.mrb[12].mxu1 %v2772_v40  ;;  %885 = vadd.xlane.f32.xlu0 %v884_v23  ;;  %v3676_v23 = vpop.f32.mrb[0].mxu1 }
 0x1e1   : > { %882 = vadd.xlane.f32.xlu1 %v881_v38  ;;  %968 = vmatprep.mubr.f32.mxu1 %v2770_v37  ;;  %v887_v18 = vadd.f32 %v2778_v25, %v2776_v46  ;;  %v3672_v37 = vpop.f32.mrb[81].mxu0  ;;  %4217 = vst [vmem:[#allocation36_spill] sm:$0xff] %v3676_v23  ;;  %v3682_v38 = vpop.f32.mrb[1].mxu1 }
 0x1e2   : > { %4215 = vst [vmem:[#allocation34_spill] sm:$0xff] %v3672_v37  ;;  %v3674_v40 = vpop.f32.mrb[82].mxu0  ;;  %4219 = vst [vmem:[#allocation38_spill] sm:$0xff] %v3682_v38 }
 0x1e3   : > { %4216 = vst [vmem:[#allocation35_spill] sm:$0xff] %v3674_v40 }
 0x1e4   : > { %969 = vmatmul.mubr.f32.gmra.mrb[14].mxu1 %v2768_v22  ;;  %1214 = vmax.xlane.f32.xlu0 %v4210_v62  ;;  %v3688_v62 = vpop.f32.mrb[2].mxu1  ;;  %v4171_v22 = vmov 0.0|0.0  }
 0x1e5   : > { %973 = vmatprep.mubr.f32.mxu1 %v2778_v25  ;;  %888 = vadd.xlane.f32.xlu1 %v887_v18  ;;  %4221 = vst [vmem:[#allocation40_spill] sm:$0xff] %v3688_v62  ;;  %v3696_v57 = vpop.f32.mrb[3].mxu1  ;;  %v4230_v62 = vmov 0.0  }
 0x1e6   : > { %4223 = vst [vmem:[#allocation42_spill] sm:$0xff] %v3696_v57  ;;  %v3698_v56 = vpop.f32.mrb[4].mxu1  ;;  %2560 = vmatprep.subr.bf16.mxu1 %v4171_v22 }
 0x1e7   : > { %4224 = vst [vmem:[#allocation43_spill] sm:$0xff] %v3698_v56  ;;  %v3702_v25 = vpop.f32.mrb[5].mxu1 }
 0x1e8   : > { %974 = vmatmul.mubr.f32.gmra.mrb[16].mxu1 %v2776_v46  ;;  %1220 = vmax.xlane.f32.xlu0 %v4212_v52  ;;  %v3680_v46 = vpop.f32.mrb[83].mxu0  ;;  %4225 = vst [vmem:[#allocation44_spill] sm:$0xff] %v3702_v25 }
 0x1e9   : > { %1217 = vmax.xlane.f32.xlu1 %v4211_v8  ;;  %4218 = vst [vmem:[#allocation37_spill] sm:$0xff] %v3680_v46  ;;  %v3686_v18 = vpop.f32.mrb[84].mxu0  ;;  %2516 = vmatprep.mubr.msk.f32.mxu1 %vm2945_vm2, %v4230_v62 }
 0x1ea   : > { %4220 = vst [vmem:[#allocation39_spill] sm:$0xff] %v3686_v18  ;;  %v3692_v52 = vpop.f32.mrb[85].mxu0 }
 0x1eb   : > { %4222 = vst [vmem:[#allocation41_spill] sm:$0xff] %v3692_v52 }
 0x1ed   : > { %1223 = vmax.xlane.f32.xlu1 %v4213_v17 }
 0x21e   : > { %v3706_v19 = vpop.f32.mrb[6].mxu1 }
 0x21f   : > { %4226 = vst [vmem:[#allocation45_spill] sm:$0xff] %v3706_v19  ;;  %v3708_v8 = vpop.f32.mrb[7].mxu1 }
 0x220   : > { %4227 = vst [vmem:[#allocation46_spill] sm:$0xff] %v3708_v8 }
 0x222   : > { %v3710_v18 = vpop.f32.mrb[8].mxu1 }
 0x223   : > { %4228 = vst [vmem:[#allocation47_spill] sm:$0xff] %v3710_v18  ;;  %v3714_v23 = vpop.f32.mrb[9].mxu1 }
 0x224   : > { %4229 = vst [vmem:[#allocation48_spill] sm:$0xff] %v3714_v23 }
 0x269   : > { %v880_v12 = vpop.xlane.xlu0 %879 }
 0x26d   : > { %v886_v57 = vpop.xlane.xlu0 %885 }
 0x26e   : > { %v883_v56 = vpop.xlane.xlu1 %882 }
 0x271   : > { %v1215_v38 = vpop.xlane.xlu0 %1214 }
 0x272   : > { %v889_v25 = vpop.xlane.xlu1 %888  ;;  %v1225_v63 = vsub.f32 %v3467_v41, %v1215_v38  ;;  %v1226_v17 = vsub.f32 %v3471_v55, %v1215_v38  ;;  %v4232_v38 = vmax.f32 %v3563_v42, %v3569_v50 }
 0x274   : > { %v1233_v19 = vmul.f32 1.442695, %v1225_v63  ;;  %v1235_v18 = vmul.f32 1.442695, %v1226_v17 }
 0x275   : > { %v1221_v8 = vpop.xlane.xlu0 %1220 }
 0x276   : > { %v1218_v40 = vpop.xlane.xlu1 %1217  ;;  %2779 = vpow2.f32 %v1233_v19  ;;  %v1229_v23 = vsub.f32 %v3508_v6, %v1221_v8  ;;  %v1230_v37 = vsub.f32 %v3510_v45, %v1221_v8  ;;  %v4234_v8 = vmax.f32 %v3596_v49, %v3598_v44 }
 0x277   : > { %v1227_v52 = vsub.f32 %v3493_v59, %v1218_v40  ;;  %v1228_v22 = vsub.f32 %v3501_v7, %v1218_v40  ;;  %2781 = vpow2.f32 %v1235_v18  ;;  %v4233_v18 = vmax.f32 %v3585_v35, %v3589_v9 }
 0x278   : > { %v1241_v4 = vmul.f32 1.442695, %v1229_v23  ;;  %v1243_v41 = vmul.f32 1.442695, %v1230_v37 }
 0x279   : > { %v1237_v46 = vmul.f32 1.442695, %v1227_v52  ;;  %v1239_v11 = vmul.f32 1.442695, %v1228_v22  ;;  %v3768_v52 = vld [vmem:[%s4128_s2] sm:$0xf] }
 0x27a   : > { %v1224_v16 = vpop.xlane.xlu1 %1223 }
 0x27b   : > { %2783 = vpow2.f32 %v1237_v46  ;;  %v1231_v55 = vsub.f32 %v3527_v3, %v1224_v16  ;;  %v1232_v63 = vsub.f32 %v3529_v61, %v1224_v16  ;;  %v4231_v46 = vmax.f32 %v3540_v54, %v3544_v39 }
 0x27c   : > { %2785 = vpow2.f32 %v1239_v11 }
 0x27d   : > { %2787 = vpow2.f32 %v1241_v4  ;;  %v1245_v59 = vmul.f32 1.442695, %v1231_v55  ;;  %v1247_v7 = vmul.f32 1.442695, %v1232_v63 }
 0x27e   : > { %2789 = vpow2.f32 %v1243_v41 }
 0x27f   : > { %2791 = vpow2.f32 %v1245_v59 }
 0x280   : > { %2793 = vpow2.f32 %v1247_v7  ;;  %v3729_v6 = vpop.eup %2779 }
 0x281   : > { %v3731_v45 = vpop.eup %2781  ;;  %2795 = vrcp.f32 %v880_v12 }
 0x282   : > { %v1249_v19 = vadd.f32 %v3731_v45, %v3729_v6  ;;  %2797 = vrcp.f32 %v883_v56 }
 0x283   : > { %2799 = vrcp.f32 %v886_v57 }
 0x284   : > { %1250 = vadd.xlane.f32.xlu0 %v1249_v19  ;;  %2801 = vrcp.f32 %v889_v25 }
 0x285   : > { %v3735_v22 = vpop.eup %2783 }
 0x286   : > { %v3737_v37 = vpop.eup %2785 }
 0x287   : > { %v3739_v16 = vpop.eup %2787  ;;  %v1252_v4 = vadd.f32 %v3737_v37, %v3735_v22 }
 0x288   : > { %v3743_v11 = vpop.eup %2789 }
 0x289   : > { %v3745_v3 = vpop.eup %2791  ;;  %v1255_v61 = vadd.f32 %v3743_v11, %v3739_v16  ;;  %1253 = vadd.xlane.f32.xlu1 %v1252_v4 }
 0x28a   : > { %v3749_v40 = vpop.eup %2793 }
 0x28b   : > { %1256 = vadd.xlane.f32.xlu0 %v1255_v61  ;;  %v1258_v23 = vadd.f32 %v3749_v40, %v3745_v3  ;;  %v2796_v17 = vpop.eup %2795 }
 0x28c   : > { %v2798_v41 = vpop.eup %2797  ;;  %v979_v59 = vmul.f32 0.00069053395, %v2796_v17 }
 0x28d   : > { %1259 = vadd.xlane.f32.xlu1 %v1258_v23  ;;  %v980_v7 = vmul.f32 0.00069053395, %v2798_v41  ;;  %v2800_v12 = vpop.eup %2799 }
 0x28e   : > { %v2802_v57 = vpop.eup %2801 }
 0x28f   : > { %v982_v17 = vmul.f32 0.00069053395, %v2802_v57 }
 0x291   : > { %1585 = vmax.xlane.f32.xlu1 %v4231_v46  ;;  %v4310_v46 = vld [vmem:[#allocation25_spill] sm:$0xff] }
 0x295   : > { %1588 = vmax.xlane.f32.xlu1 %v4232_v38 }
 0x299   : > { %1591 = vmax.xlane.f32.xlu1 %v4233_v18  ;;  %v4237_v18 = vmov 0.0|0.0  }
 0x29d   : > { %1594 = vmax.xlane.f32.xlu1 %v4234_v8  ;;  %v981_v8 = vmul.f32 0.00069053395, %v2800_v12 }
 0x2a1   : > { %1358 = vrot.lane.b32.xlu0 %v3768_v52, %s2946_s12  ;;  %s2879_s12 = scalar_lea.vmem %s4086_s7, 128 }
 0x2a2   : > { %p2880_p11 = scmp.ne.s32.totalorder %s4086_s7, %s2879_s12 }
 0x2a4   : > { %p2881_p12 = pnand %p2880_p11, %p3019_p5 }
 0x2a6   : > { %p2882_p13 = pneg %p2881_p12 }
 0x2ae   : > { %v960_v55 = vpop.f32.mrb[10].mxu1 }
 0x2af   : > { %v962_v63 = vpop.f32.mrb[11].mxu1  ;;  %v983_v4 = vmul.f32 %v979_v59, %v960_v55 }
 0x2b3   : > { %v965_v19 = vpop.f32.mrb[12].mxu1 }
 0x2b4   : > { %v984_v61 = vmul.f32 %v980_v7, %v965_v19  ;;  %v967_v23 = vpop.f32.mrb[13].mxu1  ;;  %v4238_v19 = vpack.c.bf16 %v3347_v21, %v3341_v14  ;;  %v4242_v14 = vpack.c.bf16 %v3654_v15, %v3648_v53 }
 0x2b5   : > { %v4241_v23 = vpack.c.bf16 %v3337_v10, %v3327_v1 }
 0x2b6   : > { %v2561_v56 = vpack.c.bf16 %v984_v61, %v983_v4  ;;  %v4239_v4 = vpack.c.bf16 %v3323_v60, %v3321_v58  ;;  %v4240_v61 = vpack.c.bf16 %v3365_v31, %v3362_v30 }
 0x2b7   : > { %v970_v25 = vpop.f32.mrb[14].mxu1 }
 0x2b8   : > { %v972_v38 = vpop.f32.mrb[15].mxu1  ;;  %2563 = vmatpush3.bf16.xpose.msk.msra.mxu1 %vm3773_vm4, %v2561_v56  ;;  %v985_v55 = vmul.f32 %v981_v8, %v970_v25 }
 0x2b9   : > { %2564 = vmatprep.subr.bf16.mxu1 %v4237_v18 }
 0x2bb   : > { %v975_v41 = vpop.f32.mrb[16].mxu1 }
 0x2bc   : > { %v986_v63 = vmul.f32 %v982_v17, %v975_v41  ;;  %v977_v59 = vpop.f32.mrb[17].mxu1 }
 0x2be   : > { %v2565_v7 = vpack.c.bf16 %v986_v63, %v985_v55 }
 0x2c0   : > { %2567 = vmatpush3.bf16.xpose.msk.msra.mxu1 %vm3773_vm4, %v2565_v7 }
 0x2c1   : > { %2569 = vmatprep.subr.bf16.mxu1 %v4238_v19 }
 0x2c7   : > { %2517 = vmatmul.mubr.msk.f32.vlgmr.msra.gmra.mrb[18].mxu1 %vm987_vm3, %v3768_v52 }
 0x2c8   : > { %2571 = vmatpush1.bf16.msra.mxu1 %v4239_v4  ;;  %1140 = vmatprep.mubr.f32.mxu1 %v4230_v62 }
 0x2c9   : > { %2573 = vmatprep.subr.bf16.mxu1 %v4240_v61 }
 0x2cc   : > { %2575 = vmatpush1.bf16.msra.mxu1 %v4241_v23 }
 0x2cd   : > { %2577 = vmatprep.subr.bf16.mxu1 %v4242_v14 }
 0x316   : > { %v3800_v21 = vpop.xlane.xlu1 %1253 }
 0x31a   : > { %v3802_v12 = vpop.xlane.xlu1 %1259 }
 0x31e   : > { %v1586_v58 = vpop.xlane.xlu1 %1585 }
 0x31f   : > { %v1596_v60 = vsub.f32 %v3540_v54, %v1586_v58  ;;  %v1597_v56 = vsub.f32 %v3544_v39, %v1586_v58  ;;  %v4243_v58 = vmax.f32 %v3608_v32, %v3610_v51 }
 0x321   : > { %v1604_v57 = vmul.f32 1.442695, %v1596_v60  ;;  %v1606_v30 = vmul.f32 1.442695, %v1597_v56  ;;  %v4244_v60 = vmax.f32 %v3614_v24, %v3616_v13  ;;  %v4245_v56 = vmax.f32 %v3620_v29, %v3622_v20 }
 0x322   : > { %v1589_v31 = vpop.xlane.xlu1 %1588 }
 0x323   : > { %2803 = vpow2.f32 %v1604_v57  ;;  %v1598_v1 = vsub.f32 %v3563_v42, %v1589_v31  ;;  %v1599_v10 = vsub.f32 %v3569_v50, %v1589_v31  ;;  %v4246_v57 = vmax.f32 %v3602_v0, %v3604_v43 }
 0x324   : > { %2805 = vpow2.f32 %v1606_v30 }
 0x325   : > { %v1608_v53 = vmul.f32 1.442695, %v1598_v1  ;;  %v1610_v15 = vmul.f32 1.442695, %v1599_v10  ;;  %v4247_v1 = vpack.c.bf16 %v3650_v27, %v3646_v48  ;;  %v4248_v10 = vpack.c.bf16 %v3666_v5, %v3660_v26  ;;  %v3870_v48 = vpop.xlane.xlu0 %1250 }
 0x326   : > { %v1592_v25 = vpop.xlane.xlu1 %1591 }
 0x327   : > { %2807 = vpow2.f32 %v1608_v53  ;;  %v1600_v38 = vsub.f32 %v3585_v35, %v1592_v25  ;;  %v1601_v8 = vsub.f32 %v3589_v9, %v1592_v25  ;;  %v4249_v53 = vpack.c.bf16 %v3662_v47, %v3658_v33 }
 0x328   : > { %2809 = vpow2.f32 %v1610_v15 }
 0x329   : > { %v1612_v54 = vmul.f32 1.442695, %v1600_v38  ;;  %v1614_v39 = vmul.f32 1.442695, %v1601_v8  ;;  %v3872_v27 = vpop.xlane.xlu0 %1256 }
 0x32a   : > { %v1595_v17 = vpop.xlane.xlu1 %1594 }
 0x32b   : > { %2811 = vpow2.f32 %v1612_v54  ;;  %v1602_v41 = vsub.f32 %v3596_v49, %v1595_v17  ;;  %v1603_v42 = vsub.f32 %v3598_v44, %v1595_v17 }
 0x32c   : > { %2813 = vpow2.f32 %v1614_v39 }
 0x32d   : > { %v3812_v50 = vpop.eup %2803  ;;  %v1616_v55 = vmul.f32 1.442695, %v1602_v41  ;;  %v1618_v63 = vmul.f32 1.442695, %v1603_v42  ;;  %v3876_v26 = vpop.permute.xlu0 %1358 }
 0x32e   : > { %v3814_v59 = vpop.eup %2805 }
 0x32f   : > { %2815 = vpow2.f32 %v1616_v55  ;;  %v1620_v35 = vadd.f32 %v3814_v59, %v3812_v50 }
 0x330   : > { %2817 = vpow2.f32 %v1618_v63 }
 0x331   : > { %v3818_v9 = vpop.eup %2807  ;;  %1621 = vadd.xlane.f32.xlu1 %v1620_v35 }
 0x332   : > { %v3820_v7 = vpop.eup %2809 }
 0x333   : > { %v1623_v49 = vadd.f32 %v3820_v7, %v3818_v9 }
 0x335   : > { %v3824_v44 = vpop.eup %2811  ;;  %1624 = vadd.xlane.f32.xlu1 %v1623_v49 }
 0x336   : > { %v3826_v19 = vpop.eup %2813 }
 0x337   : > { %v1626_v4 = vadd.f32 %v3826_v19, %v3824_v44 }
 0x339   : > { %v3830_v61 = vpop.eup %2815  ;;  %1627 = vadd.xlane.f32.xlu0 %v1626_v4 }
 0x33a   : > { %v3832_v23 = vpop.eup %2817 }
 0x33b   : > { %v1629_v14 = vadd.f32 %v3832_v23, %v3830_v61 }
 0x33d   : > { %1630 = vadd.xlane.f32.xlu1 %v1629_v14  ;;  %1959 = vmax.xlane.f32.xlu0 %v4243_v58 }
 0x341   : > { %1962 = vmax.xlane.f32.xlu0 %v4244_v60 }
 0x345   : > { %1965 = vmax.xlane.f32.xlu0 %v4245_v56 }
 0x34e   : > { %1729 = vrot.lane.b32.xlu1 %v3768_v52, %s2947_s13  ;;  %s2883_s13 = sshll.u32 %s2950_s22, 4  ;;  %s2884_s13 = int_to_ptr.vmem [resolvable:$false] %s2883_s13 }
 0x34f   : > { %p2886_p0 = scmp.lt.s32.totalorder %s4086_s7, %s2884_s13 }
 0x372   : > { %1956 = vmax.xlane.f32.xlu1 %v4246_v57  ;;  %v825_v57 = vrot.slane %v3356_v28, 4 }
 0x39a   : > { %v1069_v30 = vpop.f32.mrb[18].mxu1 }
 0x39b   : > { %v2518_v31 = vpop.f32.mrb[19].mxu1  ;;  %2462 = vmatmul.mubr.msk.f32.vlgmr.msra.gmra.mrb[20].mxu1 %vm987_vm3, %v1069_v30  ;;  %v834_v30 = vrot.slane %v3371_v36, 4 }
 0x39c   : > { %2579 = vmatpush1.bf16.xpose.msra.mxu1 %v4247_v1  ;;  %1329 = vmatprep.mubr.f32.mxu1 %v3731_v45  ;;  %v826_v31 = vadd.f32 %v825_v57, %v3356_v28 }
 0x39d   : > { %2581 = vmatprep.subr.bf16.mxu1 %v4248_v10  ;;  %v835_v1 = vadd.f32 %v834_v30, %v3371_v36 }
 0x39e   : > { %v827_v10 = vrot.slane %v826_v31, 2 }
 0x3a4   : > { %2583 = vmatpush1.bf16.xpose.msra.mxu1 %v4249_v53  ;;  %v836_v53 = vrot.slane %v835_v1, 2 }
 0x3a5   : > { %2584 = vmatprep.subr.bf16.mxu1 %v4237_v18 }
 0x3ab   : > { %1330 = vmatmul.mubr.f32.vlgmr.msra.gmra.mrb[22].mxu1 %v3729_v6 }
 0x3ac   : > { %1334 = vmatprep.mubr.f32.mxu1 %v3737_v37 }
 0x3af   : > { %1335 = vmatmul.mubr.f32.gmra.mrb[24].mxu1 %v3735_v22 }
 0x3b0   : > { %1339 = vmatprep.mubr.f32.mxu1 %v3743_v11 }
 0x3b3   : > { %1340 = vmatmul.mubr.f32.gmra.mrb[26].mxu1 %v3739_v16 }
 0x3b4   : > { %1344 = vmatprep.mubr.f32.mxu1 %v3749_v40 }
 0x3b7   : > { %1345 = vmatmul.mubr.f32.gmra.mrb[28].mxu1 %v3745_v3 }
 0x3b8   : > { %2527 = vmatprep.mubr.msk.f32.mxu1 %vm2945_vm2, %v4230_v62 }
 0x3be   : > { %v3874_v33 = vpop.xlane.xlu1 %1621 }
 0x3c2   : > { %v3878_v47 = vpop.xlane.xlu1 %1624 }
 0x3c6   : > { %v3880_v5 = vpop.xlane.xlu0 %1627 }
 0x3ca   : > { %v3882_v6 = vpop.xlane.xlu1 %1630  ;;  %v1960_v45 = vpop.xlane.xlu0 %1959 }
 0x3cb   : > { %v1969_v16 = vsub.f32 %v3608_v32, %v1960_v45  ;;  %v1970_v11 = vsub.f32 %v3610_v51, %v1960_v45  ;;  %v828_v45 = vadd.f32 %v827_v10, %v826_v31  ;;  %v4250_v10 = vpack.c.bf16 %v3416_v34, %v3411_v2  ;;  %v4261_v2 = vld [vmem:[#allocation34_spill] sm:$0xff] }
 0x3cd   : > { %v1979_v25 = vmul.f32 1.442695, %v1969_v16  ;;  %v1981_v39 = vmul.f32 1.442695, %v1970_v11  ;;  %v829_v16 = vrot.slane %v828_v45, 1 }
 0x3ce   : > { %v3884_v22 = vpop.permute.xlu1 %1729  ;;  %v1963_v37 = vpop.xlane.xlu0 %1962 }
 0x3cf   : > { %v1971_v38 = vsub.f32 %v3614_v24, %v1963_v37  ;;  %v1972_v17 = vsub.f32 %v3616_v13, %v1963_v37  ;;  %v837_v37 = vadd.f32 %v836_v53, %v835_v1  ;;  %v4251_v53 = vld [vmem:[#allocation6_spill] sm:$0xff] }
 0x3d1   : > { %v1983_v32 = vmul.f32 1.442695, %v1971_v38  ;;  %v1985_v42 = vmul.f32 1.442695, %v1972_v17  ;;  %v838_v11 = vrot.slane %v837_v37, 1 }
 0x3d2   : > { %v1966_v41 = vpop.xlane.xlu0 %1965 }
 0x3d3   : > { %v1973_v51 = vsub.f32 %v3620_v29, %v1966_v41 }
 0x3ff   : > { %v1957_v3 = vpop.xlane.xlu1 %1956 }
 0x400   : > { %v1967_v40 = vsub.f32 %v3602_v0, %v1957_v3  ;;  %v1968_v15 = vsub.f32 %v3604_v43, %v1957_v3  ;;  %v1974_v0 = vsub.f32 %v3622_v20, %v1966_v41  ;;  %v1987_v43 = vmul.f32 1.442695, %v1973_v51 }
 0x401   : > { %v830_v3 = vadd.f32 %v829_v16, %v828_v45  ;;  %v4252_v45 = vld [vmem:[#allocation5_spill] sm:$0xff]  ;;  %v4254_v16 = vld [vmem:[#allocation11_spill] sm:$0xff] }
 0x402   : > { %v1975_v8 = vmul.f32 1.442695, %v1967_v40  ;;  %v1977_v54 = vmul.f32 1.442695, %v1968_v15  ;;  %v1989_v24 = vmul.f32 1.442695, %v1974_v0  ;;  %v839_v40 = vadd.f32 %v838_v11, %v837_v37 }
 0x403   : > { %v4253_v37 = vpack.c.bf16 %v4251_v53, %v4252_v45  ;;  %v4255_v11 = vld [vmem:[#allocation10_spill] sm:$0xff] }
 0x404   : > { %2819 = vpow2.f32 %v1975_v8 }
 0x405   : > { %2821 = vpow2.f32 %v1977_v54 }
 0x406   : > { %2823 = vpow2.f32 %v1979_v25 }
 0x407   : > { %2825 = vpow2.f32 %v1981_v39 }
 0x408   : > { %2827 = vpow2.f32 %v1983_v32 }
 0x409   : > { %2829 = vpow2.f32 %v1985_v42 }
 0x40a   : > { %2831 = vpow2.f32 %v1987_v43 }
 0x40b   : > { %2833 = vpow2.f32 %v1989_v24 }
 0x40c   : > { %2835 = vrcp.f32 %v830_v3  ;;  %v4256_v3 = vpack.c.bf16 %v4254_v16, %v4255_v11 }
 0x40d   : > { %2837 = vrcp.f32 %v839_v40  ;;  %v4257_v40 = vld [vmem:[#allocation8_spill] sm:$0xff] }
 0x40e   : > { %v3894_v55 = vpop.eup %2819  ;;  %2839 = vrcp.f32 %v3870_v48 }
 0x40f   : > { %v3896_v63 = vpop.eup %2821  ;;  %2841 = vrcp.f32 %v3800_v21 }
 0x410   : > { %v3898_v13 = vpop.eup %2823  ;;  %v1991_v35 = vadd.f32 %v3896_v63, %v3894_v55  ;;  %2843 = vrcp.f32 %v3872_v27 }
 0x411   : > { %v3902_v29 = vpop.eup %2825  ;;  %2845 = vrcp.f32 %v3802_v12 }
 0x412   : > { %1992 = vadd.xlane.f32.xlu0 %v1991_v35  ;;  %v3904_v49 = vpop.eup %2827  ;;  %v1994_v20 = vadd.f32 %v3902_v29, %v3898_v13 }
 0x413   : > { %v3908_v4 = vpop.eup %2829 }
 0x414   : > { %v3910_v14 = vpop.eup %2831  ;;  %v1997_v58 = vadd.f32 %v3908_v4, %v3904_v49 }
 0x415   : > { %v3914_v60 = vpop.eup %2833 }
 0x416   : > { %1995 = vadd.xlane.f32.xlu0 %v1994_v20  ;;  %v2000_v56 = vadd.f32 %v3914_v60, %v3910_v14  ;;  %v2836_v15 = vpop.eup %2835 }
 0x417   : > { %v2838_v38 = vpop.eup %2837 }
 0x418   : > { %v2840_v36 = vpop.eup %2839 }
 0x419   : > { %v1350_v39 = vmul.f32 0.00069053395, %v2840_v36  ;;  %v2842_v17 = vpop.eup %2841  ;;  %v4263_v36 = vld [vmem:[#allocation35_spill] sm:$0xff] }
 0x41a   : > { %1998 = vadd.xlane.f32.xlu0 %v1997_v58  ;;  %v1351_v42 = vmul.f32 0.00069053395, %v2842_v17  ;;  %v2844_v0 = vpop.eup %2843 }
 0x41b   : > { %v1352_v20 = vmul.f32 0.00069053395, %v2844_v0  ;;  %v2846_v58 = vpop.eup %2845  ;;  %v4270_v0 = vld [vmem:[#allocation39_spill] sm:$0xff] }
 0x41c   : > { %v1353_v12 = vmul.f32 0.00069053395, %v2846_v58 }
 0x41e   : > { %2001 = vadd.xlane.f32.xlu0 %v2000_v56 }
 0x434   : > { %2100 = vrot.lane.b32.xlu0 %v3768_v52, %s2948_s14  ;;  %v4298_v52 = vld [vmem:[#allocation19_spill] sm:$0xff]  ;;  %s2885_s14 = scalar_lea.vmem %s2884_s13, 256 }
 0x435   : > { %p2887_p1 = scmp.lt.s32.totalorder %s2885_s14, %s2879_s12 }
 0x437   : > { %p2888_p2 = por %p2887_p1, %p2886_p0 }
 0x439   : > { %p2889_p3 = pnand %p2888_p2, %p2882_p13 }
 0x46e   : > { %v1142_v25 = vpop.f32.mrb[20].mxu1 }
 0x46f   : > { %v3922_v8 = vmul.f32 %v2836_v15, %v1142_v25  ;;  %v1144_v54 = vpop.f32.mrb[21].mxu1  ;;  %v4258_v15 = vld [vmem:[#allocation7_spill] sm:$0xff] }
 0x470   : > { %v3925_v28 = vmul.f32 %v2838_v38, %v1144_v54  ;;  %v4259_v25 = vpack.c.bf16 %v4257_v40, %v4258_v15  ;;  %v4260_v38 = vld [vmem:[#allocation37_spill] sm:$0xff] }
 0x471   : > { %v4262_v34 = vpack.c.bf16 %v4260_v38, %v4261_v2 }
 0x47e   : > { %v1331_v41 = vpop.f32.mrb[22].mxu1 }
 0x47f   : > { %v1354_v32 = vmul.f32 %v1350_v39, %v1331_v41  ;;  %v1333_v51 = vpop.f32.mrb[23].mxu1  ;;  %v4264_v39 = vld [vmem:[#allocation33_spill] sm:$0xff]  ;;  %v4266_v41 = vld [vmem:[#allocation38_spill] sm:$0xff] }
 0x480   : > { %v4265_v17 = vpack.c.bf16 %v4263_v36, %v4264_v39 }
 0x482   : > { %v1336_v43 = vpop.f32.mrb[24].mxu1 }
 0x483   : > { %v1355_v24 = vmul.f32 %v1351_v42, %v1336_v43  ;;  %v1338_v35 = vpop.f32.mrb[25].mxu1  ;;  %v4269_v42 = vld [vmem:[#allocation36_spill] sm:$0xff] }
 0x484   : > { %v4271_v43 = vpack.c.bf16 %v4269_v42, %v4270_v0  ;;  %v4273_v35 = vld [vmem:[#allocation12_spill] sm:$0xff]  ;;  %v4278_v42 = vld [vmem:[#allocation13_spill] sm:$0xff] }
 0x485   : > { %v2585_v48 = vpack.c.bf16 %v1355_v24, %v1354_v32  ;;  %v4267_v32 = vld [vmem:[#allocation41_spill] sm:$0xff] }
 0x486   : > { %v1341_v56 = vpop.f32.mrb[26].mxu1  ;;  %v4268_v51 = vpack.c.bf16 %v4266_v41, %v4267_v32  ;;  %v4275_v41 = vld [vmem:[#allocation17_spill] sm:$0xff] }
 0x487   : > { %v1356_v21 = vmul.f32 %v1352_v20, %v1341_v56  ;;  %v1343_v57 = vpop.f32.mrb[27].mxu1  ;;  %2587 = vmatpush3.bf16.xpose.msk.msra.mxu1 %vm3773_vm4, %v2585_v48  ;;  %v1205_v48 = vrot.slane %v4273_v35, 4 }
 0x488   : > { %2588 = vmatprep.subr.bf16.mxu1 %v4237_v18 }
 0x48a   : > { %v1346_v27 = vpop.f32.mrb[28].mxu1 }
 0x48b   : > { %v1357_v30 = vmul.f32 %v1353_v12, %v1346_v27  ;;  %v1348_v31 = vpop.f32.mrb[29].mxu1 }
 0x48d   : > { %v2589_v1 = vpack.c.bf16 %v1357_v30, %v1356_v21 }
 0x48f   : > { %2591 = vmatpush3.bf16.xpose.msk.msra.mxu1 %vm3773_vm4, %v2589_v1 }
 0x490   : > { %2593 = vmatprep.subr.bf16.mxu1 %v4250_v10 }
 0x496   : > { %2528 = vmatmul.mubr.msk.f32.vlgmr.msra.gmra.mrb[30].mxu1 %vm987_vm3, %v3876_v26 }
 0x497   : > { %2595 = vmatpush1.bf16.msra.mxu1 %v4253_v37  ;;  %1511 = vmatprep.mubr.f32.mxu1 %v4230_v62 }
 0x498   : > { %2597 = vmatprep.subr.bf16.mxu1 %v4256_v3 }
 0x49b   : > { %2599 = vmatpush1.bf16.msra.mxu1 %v4259_v25 }
 0x49c   : > { %2601 = vmatprep.subr.bf16.mxu1 %v4262_v34 }
 0x569   : > { %v1440_v54 = vpop.f32.mrb[30].mxu1 }
 0x56a   : > { %v2529_v26 = vpop.f32.mrb[31].mxu1  ;;  %2468 = vmatmul.mubr.msk.f32.vlgmr.msra.gmra.mrb[32].mxu1 %vm987_vm3, %v1440_v54 }
 0x56b   : > { %2603 = vmatpush1.bf16.xpose.msra.mxu1 %v4265_v17  ;;  %1700 = vmatprep.mubr.f32.mxu1 %v3814_v59  ;;  %v4272_v59 = vld [vmem:[#allocation9_spill] sm:$0xff]  ;;  %v4274_v17 = vld [vmem:[#allocation18_spill] sm:$0xff] }
 0x56c   : > { %2605 = vmatprep.subr.bf16.mxu1 %v4268_v51  ;;  %v1196_v24 = vrot.slane %v4272_v59, 4  ;;  %v4276_v32 = vpack.c.bf16 %v4274_v17, %v4275_v41  ;;  %v4277_v51 = vld [vmem:[#allocation14_spill] sm:$0xff] }
 0x56d   : > { %v4279_v0 = vpack.c.bf16 %v4277_v51, %v4278_v42 }
 0x573   : > { %2607 = vmatpush1.bf16.xpose.msra.mxu1 %v4271_v43  ;;  %v4280_v43 = vld [vmem:[#allocation21_spill] sm:$0xff] }
 0x574   : > { %2608 = vmatprep.subr.bf16.mxu1 %v4237_v18 }
 0x57a   : > { %1701 = vmatmul.mubr.f32.vlgmr.msra.gmra.mrb[34].mxu1 %v3812_v50  ;;  %v1197_v50 = vadd.f32 %v1196_v24, %v4272_v59  ;;  %v4281_v59 = vld [vmem:[#allocation20_spill] sm:$0xff] }
 0x57b   : > { %1705 = vmatprep.mubr.f32.mxu1 %v3820_v7  ;;  %v1206_v7 = vadd.f32 %v1205_v48, %v4273_v35  ;;  %v4282_v24 = vpack.c.bf16 %v4280_v43, %v4281_v59  ;;  %v4283_v35 = vld [vmem:[#allocation16_spill] sm:$0xff]  ;;  %v4284_v48 = vld [vmem:[#allocation15_spill] sm:$0xff] }
 0x57d   : > { %v1207_v20 = vrot.slane %v1206_v7, 2 }
 0x57e   : > { %1706 = vmatmul.mubr.f32.gmra.mrb[36].mxu1 %v3818_v9  ;;  %v1198_v9 = vrot.slane %v1197_v50, 2 }
 0x57f   : > { %1710 = vmatprep.mubr.f32.mxu1 %v3826_v19  ;;  %v1208_v58 = vadd.f32 %v1207_v20, %v1206_v7  ;;  %v4286_v7 = vld [vmem:[#allocation44_spill] sm:$0xff] }
 0x580   : > { %v1199_v19 = vadd.f32 %v1198_v9, %v1197_v50  ;;  %v4285_v50 = vpack.c.bf16 %v4283_v35, %v4284_v48  ;;  %v4287_v9 = vld [vmem:[#allocation42_spill] sm:$0xff] }
 0x581   : > { %v1209_v56 = vrot.slane %v1208_v58, 1  ;;  %v4288_v20 = vpack.c.bf16 %v4286_v7, %v4287_v9  ;;  %v4300_v9 = vld [vmem:[#allocation28_spill] sm:$0xff] }
 0x582   : > { %1711 = vmatmul.mubr.f32.gmra.mrb[38].mxu1 %v3824_v44  ;;  %v1200_v44 = vrot.slane %v1199_v19, 1 }
 0x583   : > { %1715 = vmatprep.mubr.f32.mxu1 %v3832_v23  ;;  %v1210_v21 = vadd.f32 %v1209_v56, %v1208_v58  ;;  %v4289_v58 = vld [vmem:[#allocation43_spill] sm:$0xff] }
 0x584   : > { %v1201_v23 = vadd.f32 %v1200_v44, %v1199_v19  ;;  %v4290_v44 = vld [vmem:[#allocation40_spill] sm:$0xff] }
 0x585   : > { %v4291_v56 = vpack.c.bf16 %v4289_v58, %v4290_v44  ;;  %v4303_v58 = vld [vmem:[#allocation24_spill] sm:$0xff]  ;;  %v4304_v44 = vld [vmem:[#allocation23_spill] sm:$0xff] }
 0x586   : > { %1716 = vmatmul.mubr.f32.gmra.mrb[40].mxu1 %v3830_v61  ;;  %2847 = vrcp.f32 %v1201_v23  ;;  %v4292_v23 = vld [vmem:[#allocation48_spill] sm:$0xff] }
 0x587   : > { %2538 = vmatprep.mubr.msk.f32.mxu1 %vm2945_vm2, %v4230_v62  ;;  %2849 = vrcp.f32 %v1210_v21  ;;  %v4293_v21 = vld [vmem:[#allocation46_spill] sm:$0xff] }
 0x588   : > { %2851 = vrcp.f32 %v3874_v33 }
 0x589   : > { %2853 = vrcp.f32 %v3878_v47 }
 0x58a   : > { %2855 = vrcp.f32 %v3880_v5 }
 0x58b   : > { %2857 = vrcp.f32 %v3882_v6 }
 0x590   : > { %v2848_v61 = vpop.eup %2847 }
 0x591   : > { %v2850_v12 = vpop.eup %2849 }
 0x592   : > { %v2852_v53 = vpop.eup %2851 }
 0x593   : > { %v1721_v45 = vmul.f32 0.00069053395, %v2852_v53  ;;  %v2854_v37 = vpop.eup %2853 }
 0x594   : > { %v1722_v33 = vmul.f32 0.00069053395, %v2854_v37  ;;  %v2856_v40 = vpop.eup %2855 }
 0x595   : > { %v2858_v2 = vpop.eup %2857 }
 0x596   : > { %v1724_v5 = vmul.f32 0.00069053395, %v2858_v2 }
 0x63d   : > { %v1513_v57 = vpop.f32.mrb[32].mxu1 }
 0x63e   : > { %v1518_v27 = vmul.f32 %v2848_v61, %v1513_v57  ;;  %v1515_v30 = vpop.f32.mrb[33].mxu1  ;;  %v4294_v61 = vpack.c.bf16 %v4292_v23, %v4293_v21  ;;  %v4295_v57 = vld [vmem:[#allocation47_spill] sm:$0xff]  ;;  %v4307_v23 = vld [vmem:[#allocation29_spill] sm:$0xff] }
 0x63f   : > { %v1519_v31 = vmul.f32 %v2850_v12, %v1515_v30  ;;  %v4296_v12 = vld [vmem:[#allocation45_spill] sm:$0xff]  ;;  %v4299_v30 = vld [vmem:[#allocation22_spill] sm:$0xff] }
 0x640   : > { %v3980_v1 = vadd.f32 %v1518_v27, %v3922_v8  ;;  %v4297_v27 = vpack.c.bf16 %v4295_v57, %v4296_v12  ;;  %v272_v12 = vld [vmem:[%s4129_s3] sm:$0xf] }
 0x641   : > { %v3983_v10 = vadd.f32 %v1519_v31, %v3925_v28  ;;  %v1723_v28 = vmul.f32 0.00069053395, %v2856_v40  ;;  %v1576_v31 = vrot.slane %v4299_v30, 4 }
 0x64d   : > { %v1702_v16 = vpop.f32.mrb[34].mxu1 }
 0x64e   : > { %v1725_v11 = vmul.f32 %v1721_v45, %v1702_v16  ;;  %v1704_v3 = vpop.f32.mrb[35].mxu1 }
 0x651   : > { %v1707_v15 = vpop.f32.mrb[36].mxu1 }
 0x652   : > { %v1726_v8 = vmul.f32 %v1722_v33, %v1707_v15  ;;  %v1709_v25 = vpop.f32.mrb[37].mxu1 }
 0x654   : > { %v2609_v38 = vpack.c.bf16 %v1726_v8, %v1725_v11 }
 0x655   : > { %v1712_v34 = vpop.f32.mrb[38].mxu1 }
 0x656   : > { %v1727_v47 = vmul.f32 %v1723_v28, %v1712_v34  ;;  %v1714_v54 = vpop.f32.mrb[39].mxu1  ;;  %2611 = vmatpush3.bf16.xpose.msk.msra.mxu1 %vm3773_vm4, %v2609_v38 }
 0x657   : > { %2612 = vmatprep.subr.bf16.mxu1 %v4237_v18 }
 0x659   : > { %v1717_v6 = vpop.f32.mrb[40].mxu1 }
 0x65a   : > { %v1728_v26 = vmul.f32 %v1724_v5, %v1717_v6  ;;  %v1719_v36 = vpop.f32.mrb[41].mxu1 }
 0x65c   : > { %v2613_v39 = vpack.c.bf16 %v1728_v26, %v1727_v47 }
 0x65e   : > { %2615 = vmatpush3.bf16.xpose.msk.msra.mxu1 %vm3773_vm4, %v2613_v39 }
 0x65f   : > { %2617 = vmatprep.subr.bf16.mxu1 %v4276_v32 }
 0x665   : > { %2539 = vmatmul.mubr.msk.f32.vlgmr.msra.gmra.mrb[42].mxu1 %vm987_vm3, %v3884_v22 }
 0x666   : > { %2619 = vmatpush1.bf16.msra.mxu1 %v4279_v0  ;;  %1882 = vmatprep.mubr.f32.mxu1 %v4230_v62 }
 0x667   : > { %2621 = vmatprep.subr.bf16.mxu1 %v4282_v24 }
 0x66a   : > { %2623 = vmatpush1.bf16.msra.mxu1 %v4285_v50 }
 0x66b   : > { %2625 = vmatprep.subr.bf16.mxu1 %v4288_v20  ;;  %v4301_v20 = vld [vmem:[#allocation27_spill] sm:$0xff] }
 0x738   : > { %v1811_v22 = vpop.f32.mrb[42].mxu1 }
 0x739   : > { %v2540_v19 = vpop.f32.mrb[43].mxu1  ;;  %2474 = vmatmul.mubr.msk.f32.vlgmr.msra.gmra.mrb[44].mxu1 %vm987_vm3, %v1811_v22  ;;  %v4302_v22 = vpack.c.bf16 %v4300_v9, %v4301_v20 }
 0x73a   : > { %2627 = vmatpush1.bf16.xpose.msra.mxu1 %v4291_v56  ;;  %2071 = vmatprep.mubr.f32.mxu1 %v3896_v63  ;;  %v1567_v63 = vrot.slane %v4298_v52, 4  ;;  %v4306_v56 = vld [vmem:[#allocation31_spill] sm:$0xff] }
 0x73b   : > { %2629 = vmatprep.subr.bf16.mxu1 %v4294_v61  ;;  %v4308_v21 = vpack.c.bf16 %v4306_v56, %v4307_v23  ;;  %v4309_v61 = vld [vmem:[#allocation26_spill] sm:$0xff] }
 0x73c   : > { %v4311_v57 = vpack.c.bf16 %v4309_v61, %v4310_v46 }
 0x742   : > { %2631 = vmatpush1.bf16.xpose.msra.mxu1 %v4297_v27  ;;  %v2949_v27 = vmov 0  }
 0x743   : > { %2632 = vmatprep.subr.bf16.mxu1 %v4237_v18  ;;  %2696 = vset.pattern.permute.xlu1 %v2949_v27 }
 0x744   : > { %2697 = vset.pattern.permute.xlu0 %v2949_v27  ;;  %2266 = vperm.xlu1 %2696, %v272_v12  }
 0x749   : > { %2072 = vmatmul.mubr.f32.vlgmr.msra.gmra.mrb[46].mxu1 %v3894_v55  ;;  %v1568_v55 = vadd.f32 %v1567_v63, %v4298_v52 }
 0x74a   : > { %2076 = vmatprep.mubr.f32.mxu1 %v3902_v29  ;;  %v1577_v29 = vadd.f32 %v1576_v31, %v4299_v30  ;;  %v4312_v30 = vld [vmem:[#allocation30_spill] sm:$0xff] }
 0x74b   : > { %v1938_v31 = vrot.slane %v4312_v30, 4 }
 0x74c   : > { %v1578_v53 = vrot.slane %v1577_v29, 2 }
 0x74d   : > { %2077 = vmatmul.mubr.f32.gmra.mrb[48].mxu1 %v3898_v13  ;;  %v1569_v13 = vrot.slane %v1568_v55, 2 }
 0x74e   : > { %2081 = vmatprep.mubr.f32.mxu1 %v3908_v4  ;;  %v1579_v45 = vadd.f32 %v1578_v53, %v1577_v29 }
 0x74f   : > { %v1570_v4 = vadd.f32 %v1569_v13, %v1568_v55  ;;  %v4313_v55 = vld [vmem:[#allocation32_spill] sm:$0xff]  ;;  %v1939_v13 = vadd.f32 %v1938_v31, %v4312_v30 }
 0x750   : > { %v1580_v37 = vrot.slane %v1579_v45, 1  ;;  %v1947_v29 = vrot.slane %v4313_v55, 4 }
 0x751   : > { %2082 = vmatmul.mubr.f32.gmra.mrb[50].mxu1 %v3904_v49  ;;  %v1571_v49 = vrot.slane %v1570_v4, 1 }
 0x752   : > { %2086 = vmatprep.mubr.f32.mxu1 %v3914_v60  ;;  %v1581_v16 = vadd.f32 %v1580_v37, %v1579_v45  ;;  %v1948_v53 = vadd.f32 %v1947_v29, %v4313_v55 }
 0x753   : > { %v1572_v60 = vadd.f32 %v1571_v49, %v1570_v4  ;;  %v1940_v4 = vrot.slane %v1939_v13, 2 }
 0x754   : > { %v1949_v45 = vrot.slane %v1948_v53, 2 }
 0x755   : > { %2087 = vmatmul.mubr.f32.gmra.mrb[52].mxu1 %v3910_v14  ;;  %2859 = vrcp.f32 %v1572_v60  ;;  %v1993_v14 = vpop.xlane.xlu0 %1992  ;;  %v1941_v49 = vadd.f32 %v1940_v4, %v1939_v13 }
 0x756   : > { %2549 = vmatprep.mubr.msk.f32.mxu1 %vm2945_vm2, %v4230_v62  ;;  %2861 = vrcp.f32 %v1581_v16  ;;  %v1950_v37 = vadd.f32 %v1949_v45, %v1948_v53 }
 0x757   : > { %2863 = vrcp.f32 %v1993_v14  ;;  %v1942_v60 = vrot.slane %v1941_v49, 1 }
 0x758   : > { %v1951_v16 = vrot.slane %v1950_v37, 1 }
 0x759   : > { %v1996_v11 = vpop.xlane.xlu0 %1995  ;;  %v1943_v14 = vadd.f32 %v1942_v60, %v1941_v49 }
 0x75a   : > { %2865 = vrcp.f32 %v1996_v11  ;;  %v1952_v11 = vadd.f32 %v1951_v16, %v1950_v37 }
 0x75d   : > { %v1999_v2 = vpop.xlane.xlu0 %1998 }
 0x75e   : > { %2867 = vrcp.f32 %v1999_v2 }
 0x75f   : > { %v2860_v3 = vpop.eup %2859 }
 0x760   : > { %v2862_v40 = vpop.eup %2861 }
 0x761   : > { %v2002_v34 = vpop.xlane.xlu0 %2001  ;;  %v2864_v47 = vpop.eup %2863 }
 0x762   : > { %2869 = vrcp.f32 %v2002_v34  ;;  %v2092_v26 = vmul.f32 0.00069053395, %v2864_v47 }
 0x763   : > { %2871 = vrcp.f32 %v1943_v14 }
 0x764   : > { %v2866_v54 = vpop.eup %2865  ;;  %2873 = vrcp.f32 %v1952_v11 }
 0x765   : > { %v2093_v36 = vmul.f32 0.00069053395, %v2866_v54  ;;  %v2101_v19 = vpop.permute.xlu0 %2100 }
 0x768   : > { %v2868_v32 = vpop.eup %2867 }
 0x769   : > { %v2094_v43 = vmul.f32 0.00069053395, %v2868_v32 }
 0x7c3   : > { %v2267_v47 = vpop.permute.xlu1 %2266 }
 0x80c   : > { %v1884_v33 = vpop.f32.mrb[44].mxu1 }
 0x80d   : > { %v1889_v15 = vmul.f32 %v2860_v3, %v1884_v33  ;;  %v1886_v8 = vpop.f32.mrb[45].mxu1 }
 0x80e   : > { %v1890_v25 = vmul.f32 %v2862_v40, %v1886_v8 }
 0x80f   : > { %v4038_v38 = vadd.f32 %v1889_v15, %v3980_v1 }
 0x810   : > { %v4041_v28 = vadd.f32 %v1890_v25, %v3983_v10  ;;  %v2870_v10 = vpop.eup %2869 }
 0x811   : > { %v2095_v59 = vmul.f32 0.00069053395, %v2870_v10  ;;  %v2872_v3 = vpop.eup %2871 }
 0x812   : > { %v2874_v40 = vpop.eup %2873 }
 0x81c   : > { %v2073_v5 = vpop.f32.mrb[46].mxu1 }
 0x81d   : > { %v2075_v6 = vpop.f32.mrb[47].mxu1  ;;  %v2096_v17 = vmul.f32 %v2092_v26, %v2073_v5 }
 0x820   : > { %v2078_v39 = vpop.f32.mrb[48].mxu1 }
 0x821   : > { %v2097_v41 = vmul.f32 %v2093_v36, %v2078_v39  ;;  %v2080_v1 = vpop.f32.mrb[49].mxu1 }
 0x823   : > { %v2633_v51 = vpack.c.bf16 %v2097_v41, %v2096_v17 }
 0x824   : > { %v2083_v42 = vpop.f32.mrb[50].mxu1 }
 0x825   : > { %v2085_v0 = vpop.f32.mrb[51].mxu1  ;;  %2635 = vmatpush3.bf16.xpose.msk.msra.mxu1 %vm3773_vm4, %v2633_v51  ;;  %v2098_v35 = vmul.f32 %v2094_v43, %v2083_v42 }
 0x826   : > { %2636 = vmatprep.subr.bf16.mxu1 %v4237_v18  ;;  %v4305_v18 = vpack.c.bf16 %v4303_v58, %v4304_v44 }
 0x828   : > { %v2088_v24 = vpop.f32.mrb[52].mxu1 }
 0x829   : > { %v2099_v48 = vmul.f32 %v2095_v59, %v2088_v24  ;;  %v2090_v50 = vpop.f32.mrb[53].mxu1 }
 0x82b   : > { %v2637_v7 = vpack.c.bf16 %v2099_v48, %v2098_v35 }
 0x82d   : > { %2639 = vmatpush3.bf16.xpose.msk.msra.mxu1 %vm3773_vm4, %v2637_v7 }
 0x82e   : > { %2641 = vmatprep.subr.bf16.mxu1 %v4302_v22 }
 0x834   : > { %2550 = vmatmul.mubr.msk.f32.vlgmr.msra.gmra.mrb[54].mxu1 %vm987_vm3, %v2101_v19 }
 0x835   : > { %2643 = vmatpush1.bf16.msra.mxu1 %v4305_v18  ;;  %2253 = vmatprep.mubr.f32.mxu1 %v4230_v62  ;;  %v273_v62 = vld [vmem:[%s4130_s4] sm:$0xf] }
 0x836   : > { %2645 = vmatprep.subr.bf16.mxu1 %v4308_v21  ;;  %2316 = vperm.xlu1 %2696, %v273_v62  }
 0x839   : > { %2647 = vmatpush1.bf16.msra.mxu1 %v4311_v57 }
 0x8b5   : > { %v2317_v55 = vpop.permute.xlu1 %2316 }
 0x907   : > { %v2182_v52 = vpop.f32.mrb[54].mxu1 }
 0x908   : > { %v2551_v63 = vpop.f32.mrb[55].mxu1  ;;  %2480 = vmatmul.mubr.msk.f32.vlgmr.msra.gmra.mrb[56].mxu1 %vm987_vm3, %v2182_v52 }
 0x9db   : > { %v2255_v33 = vpop.f32.mrb[56].mxu1 }
 0x9dc   : > { %v2260_v15 = vmul.f32 %v2872_v3, %v2255_v33  ;;  %v2257_v8 = vpop.f32.mrb[57].mxu1 }
 0x9dd   : > { %v2261_v25 = vmul.f32 %v2874_v40, %v2257_v8 }
 0x9de   : > { %v2262_v2 = vadd.f32 %v2260_v15, %v4038_v38 }
 0x9df   : > { %v2263_v34 = vadd.f32 %v2261_v25, %v4041_v28 }
 0x9e0   : > { %v2269_v54 = vadd.f32 %v2267_v47, %v2262_v2 }
 0x9e1   : > { %v2270_v5 = vadd.f32 %v2267_v47, %v2263_v34 }
 0x9e2   : > { %v2271_v6 = vsel %vm422_vm0, %v2269_v54, 0.0 }
 0x9e3   : > { %v2272_v26 = vrot.slane %v2271_v6, 4  ;;  %v2278_v36 = vsel %vm422_vm0, %v2270_v5, 0.0 }
 0x9e4   : > { %v2279_v39 = vrot.slane %v2278_v36, 4 }
 0x9e5   : > { %v2273_v17 = vadd.f32 %v2272_v26, %v2271_v6 }
 0x9e6   : > { %v2280_v41 = vadd.f32 %v2279_v39, %v2278_v36 }
 0x9e7   : > { %v2274_v1 = vrot.slane %v2273_v17, 2 }
 0x9e8   : > { %v2281_v32 = vrot.slane %v2280_v41, 2 }
 0x9e9   : > { %v2275_v51 = vadd.f32 %v2274_v1, %v2273_v17 }
 0x9ea   : > { %v2282_v10 = vadd.f32 %v2281_v32, %v2280_v41 }
 0x9eb   : > { %v2276_v42 = vrot.slane %v2275_v51, 1 }
 0x9ec   : > { %v2283_v0 = vrot.slane %v2282_v10, 1 }
 0x9ed   : > { %v2277_v38 = vadd.f32 %v2276_v42, %v2275_v51 }
 0x9ee   : > { %v2284_v43 = vadd.f32 %v2283_v0, %v2282_v10 }
 0x9ef   : > { %v2286_v28 = vmul.f32 0.25, %v2277_v38 }
 0x9f0   : > { %v2287_v59 = vmul.f32 0.25, %v2284_v43 }
 0x9f1   : > { %v2288_v24 = vsub.f32 %v2269_v54, %v2286_v28 }
 0x9f2   : > { %v2289_v35 = vsub.f32 %v2270_v5, %v2287_v59 }
 0x9f3   : > { %v2290_v48 = vmul.f32 %v2288_v24, %v2288_v24 }
 0x9f4   : > { %v2291_v50 = vmul.f32 %v2289_v35, %v2289_v35 }
 0x9f5   : > { %v2292_v7 = vsel %vm422_vm0, %v2290_v48, 0.0 }
 0x9f6   : > { %v2293_v9 = vrot.slane %v2292_v7, 4  ;;  %v2299_v20 = vsel %vm422_vm0, %v2291_v50, 0.0 }
 0x9f7   : > { %v2300_v22 = vrot.slane %v2299_v20, 4 }
 0x9f8   : > { %v2294_v19 = vadd.f32 %v2293_v9, %v2292_v7 }
 0x9f9   : > { %v2301_v58 = vadd.f32 %v2300_v22, %v2299_v20 }
 0x9fa   : > { %v2295_v44 = vrot.slane %v2294_v19, 2 }
 0x9fb   : > { %v2302_v18 = vrot.slane %v2301_v58, 2 }
 0x9fc   : > { %v2296_v56 = vadd.f32 %v2295_v44, %v2294_v19 }
 0x9fd   : > { %v2303_v23 = vadd.f32 %v2302_v18, %v2301_v58 }
 0x9fe   : > { %v2297_v21 = vrot.slane %v2296_v56, 1 }
 0x9ff   : > { %v2304_v61 = vrot.slane %v2303_v23, 1 }
 0xa00   : > { %v2298_v46 = vadd.f32 %v2297_v21, %v2296_v56 }
 0xa01   : > { %v2305_v57 = vadd.f32 %v2304_v61, %v2303_v23 }
 0xa02   : > { %v2306_v12 = vmul.f32 0.25, %v2298_v46 }
 0xa03   : > { %v2307_v27 = vmul.f32 0.25, %v2305_v57 }
 0xa04   : > { %v2308_v62 = vadd.f32 1e-05, %v2306_v12 }
 0xa05   : > { %v2309_v52 = vadd.f32 1e-05, %v2307_v27 }
 0xa06   : > { %2875 = vrsqrt.f32 %v2308_v62 }
 0xa07   : > { %2877 = vrsqrt.f32 %v2309_v52 }
 0xa10   : > { %v2876_v63 = vpop.eup %2875 }
 0xa11   : > { %v2878_v30 = vpop.eup %2877  ;;  %v2312_v31 = vmul.f32 %v2876_v63, %v2288_v24 }
 0xa12   : > { %v2313_v29 = vmul.f32 %v2878_v30, %v2289_v35 }
 0xa13   : > { %v2319_v13 = vmul.f32 %v2317_v55, %v2312_v31 }
 0xa14   : > { %v2320_v53 = vmul.f32 %v2317_v55, %v2313_v29 }
 0xa16   : > { %v2323_v4 = vcombine.low %v2319_v13, %v2320_v53 }
 0xa18   : > { %2325 = vst [vmem:[%s217_s6] sm:$0xff] %v2323_v4 }
 0xa19   : > { %2892 = shalt.err (!%p2889_p3)
}
 0xa1a   : > { %s2893_s15 = scalar_lea.hbm %s4084_s10, 128  ;;  %s2897_s23 = scalar_lea.hbm %s4131_s5, 256 }
 0xa1b   : > { %p2894_p4 = scmp.ne.s32.totalorder %s4084_s10, %s2893_s15  ;;  %p2898_p9 = scmp.lt.u32.totalorder %s4084_s10, %s4131_s5 }
 0xa1c   : > { %p2899_p10 = scmp.lt.u32.totalorder %s2897_s23, %s2893_s15  ;;  %p2901_p12 = scmp.lt.u32.totalorder %s2893_s15, %s4084_s10 }
 0xa1d   : > { %p2895_p7 = pnand %p2894_p4, %p3019_p5 }
 0xa1e   : > { %p2900_p11 = por %p2899_p10, %p2898_p9 }
 0xa1f   : > { %p2896_p8 = pneg %p2895_p7 }
 0xa20   : > { %p2902_p13 = por %p2901_p12, %p2900_p11 }
 0xa22   : > { %p2903_p0 = pnand %p2902_p13, %p2896_p8 }
 0xa24   : > { %2906 = shalt.err (!%p2903_p0)
}
 0xa25   : > { %2650 = dma.vmem_to_hbm [thread:$0]  (%p3019_p5), %s4086_s7, 128, %s4084_s10, %s2327_s11  }
 0xa26 PF: > { %p2656_p1 = scmp.ge.s32.totalorder %s2941_s21, 2  ;;  %s2353_s30 = sand.u32 1, %s2929_s18  }
 0xa27   : > { %s2354_s6 = scalar_lea.sflag [#allocation3], %s2353_s30 }
 0xa28   : > { %p2653_p2 = pnand %p2656_p1, %p3023_p6 }
 0xa2a   : > { %2924 = dma.done.wait (!%p2653_p2), %s2354_s6, 128  }
 0xa2b   : > { %2926 = vsyncadd (!%p2653_p2), %s2354_s6, 4294967168  ;;  %p15_p3 = scmp.ge.s32.totalorder %s3006_s24, 4   ;;  %s4314_s18 = smov %s2933_s19 }
 0xa2c   : > { %s4315_s19 = smov %s2937_s20  ;;  %s4316_s20 = smov %s3017_s27 }
 0xa2d   : > { %s4317_s21 = smov %s3006_s24  ;;  %17 = sbr.rel (!%p15_p3) target bundleno = 3 (0x3), region = 75 }
 0xa34   :  { %2359 = vsyncpa [#allocation3], 1 }
 0xa35   :  { %2361 = vsyncpa [#allocation3 + $0x1], 1 }

</bundles_post_ra>
